<compile_context>
chip_gen: v6e
topology: v6e:2x2x1
jax: 0.10.0
libtpu: 0.0.40
codegen_flags: <defaults>
</compile_context>

<pallas_src>
import functools
import math

import jax
import jax.numpy as jnp
from jax import lax
from jax.experimental import pallas as pl
from jax.experimental.pallas import tpu as pltpu

LANE = 128
SUBLANE = 8
BATCH_PAD = 16          # bf16 sublane tile: cleaner MXU packing than 8


def _round_up(x, m):
    return ((x + m - 1) // m) * m


def _largest_divisor_leq(n, cap):
    for d in range(min(n, cap), 0, -1):
        if n % d == 0:
            return d
    return 1


def _largest_aligned_divisor(n, cap, align):
    """Largest d <= cap with n % d == 0 and d % align == 0 (n % align == 0)."""
    best = align
    d = align
    while d <= min(n, cap):
        if n % d == 0:
            best = d
        d += align
    return best


def _vmem_limit(est_bytes, lo=16 << 20, hi=48 << 20):
    """Explicit scoped-VMEM request with headroom; safe on v5e/v6e/v7x."""
    return int(min(hi, max(lo, 2 * est_bytes)))


# ----------------------- row-tiled dense (+activation) -----------------------

def _dense_kernel(x_ref, w_ref, b_ref, o_ref, *, activation):
    # bf16 matmul operands, f32 accumulation, f32 elementwise.
    x = x_ref[...].astype(w_ref.dtype)
    y = jnp.dot(x, w_ref[...], preferred_element_type=jnp.float32) + b_ref[...]
    if activation is not None:
        y = activation(y)
    o_ref[...] = y.astype(o_ref.dtype)


def dense(x, w_T, b, *, activation=None, row_tile=512, f_tile_cap=2048):
    """y = activation(x @ w_T + b). x: (N, D), w_T: (D, F), b: (1, F) -> (N, F) f32."""
    N, D = x.shape
    F = w_T.shape[1]
    # Fixed row tile + row padding (no divisor-search tiny-tile cliff).
    tn = row_tile if N > row_tile else _round_up(N, SUBLANE)
    Np = _round_up(N, tn)
    if Np != N:
        x = jnp.pad(x, ((0, Np - N), (0, 0)))
    # Tile the output dim only when the weight block would be large.
    tf = F if F <= f_tile_cap else _largest_aligned_divisor(F, f_tile_cap, LANE)
    nf = F // tf

    if nf == 1:   # constant blocks -> single-buffer them
        w_spec = pl.BlockSpec((D, tf), lambda i, j: (0, j),
                              pipeline_mode=pl.Buffered(1))
        b_spec = pl.BlockSpec((1, tf), lambda i, j: (0, j),
                              pipeline_mode=pl.Buffered(1))
        w_bufs = 1
    else:
        w_spec = pl.BlockSpec((D, tf), lambda i, j: (0, j))
        b_spec = pl.BlockSpec((1, tf), lambda i, j: (0, j))
        w_bufs = 2

    est = (2 * tn * D * x.dtype.itemsize
           + w_bufs * D * tf * w_T.dtype.itemsize
           + 2 * tn * tf * 4 + tf * 4)
    flops = 2 * Np * D * F
    transcendentals = Np * F if activation is not None else 0
    bytes_accessed = (Np * D * x.dtype.itemsize
                      + D * F * w_T.dtype.itemsize + F * 4 + Np * F * 4)

    out = pl.pallas_call(
        functools.partial(_dense_kernel, activation=activation),
        out_shape=jax.ShapeDtypeStruct((Np, F), jnp.float32),
        grid_spec=pltpu.PrefetchScalarGridSpec(
            num_scalar_prefetch=0,
            grid=(Np // tn, nf),
            in_specs=[
                pl.BlockSpec((tn, D), lambda i, j: (i, 0)),
                w_spec,
                b_spec,
            ],
            out_specs=pl.BlockSpec((tn, tf), lambda i, j: (i, j)),
        ),
        compiler_params=pltpu.CompilerParams(
            dimension_semantics=("parallel", "parallel"),
            vmem_limit_bytes=_vmem_limit(est)),
        cost_estimate=pl.CostEstimate(
            flops=flops, transcendentals=transcendentals,
            bytes_accessed=bytes_accessed),
    )(x, w_T, b)
    return out[:N]


# -------------------- fused LSTM layer (proj + recurrence) --------------------

def _lstm_layer_kernel(x_ref, wih_ref, whh_ref, b_ref, out_ref,
                       h_scr, c_scr, gx_scr, *, unroll):
    """One (batch-tile, time-chunk) grid step of a single LSTM layer.

    x_ref  : (tc, Bt, D)    layer input chunk (bf16)
    wih_ref: (D, 4Hp)       W_ih^T (bf16, single-buffered constant)
    whh_ref: (Hp, 4Hp)      W_hh^T (bf16, single-buffered constant)
    b_ref  : (1, 4Hp)       b_ih + b_hh (f32), gate order (i, f, o, g)
    out_ref: (tc, Bt, Hp)   hidden states for this chunk (bf16)
    h_scr/c_scr: (Bt, Hp)   recurrent state carried across time chunks (f32)
    gx_scr : (tc, Bt, 4Hp)  staged input-projection gates for the chunk (f32)
    """
    tc, Bt, D = x_ref.shape
    Hp = h_scr.shape[1]
    G = 4 * Hp

    @pl.when(pl.program_id(1) == 0)       # first time-chunk of this batch tile
    def _():
        h_scr[...] = jnp.zeros_like(h_scr)
        c_scr[...] = jnp.zeros_like(c_scr)

    # Fused, hoisted input projection: one (tc*Bt, D) @ (D, 4Hp) MXU matmul for
    # the whole chunk, staged in VMEM scratch (keeps vreg pressure bounded and
    # off the serial critical path). No gates_x HBM roundtrip.
    x = x_ref[...].astype(wih_ref.dtype).reshape(tc * Bt, D)
    gx = jnp.dot(x, wih_ref[...], preferred_element_type=jnp.float32) + b_ref[...]
    gx_scr[...] = gx.reshape(tc, Bt, G)

    def step(i, carry):
        h_prev, c_prev = carry
        gates = gx_scr[i] + jnp.dot(
            h_prev.astype(whh_ref.dtype), whh_ref[...],
            preferred_element_type=jnp.float32)            # (Bt, 4Hp) f32
        # Gate order (i, f, o, g): one sigmoid over a contiguous 3Hp slab plus
        # one tanh (fewer, larger EUP issues); all slices stay lane-aligned.
        sig = jax.nn.sigmoid(gates[:, :3 * Hp])
        g_g = jnp.tanh(gates[:, 3 * Hp:])
        i_g = sig[:, 0 * Hp:1 * Hp]
        f_g = sig[:, 1 * Hp:2 * Hp]
        o_g = sig[:, 2 * Hp:3 * Hp]
        c_new = f_g * c_prev + i_g * g_g
        h_new = o_g * jnp.tanh(c_new)
        out_ref[i] = h_new.astype(out_ref.dtype)           # single bf16 store
        return (h_new, c_new)

    h_last, c_last = lax.fori_loop(
        0, tc, step, (h_scr[...], c_scr[...]), unroll=unroll)
    h_scr[...] = h_last
    c_scr[...] = c_last


def _pick_time_chunk(T, Bt, D, Hp, budget_bytes):
    """Largest divisor-of-T time chunk whose VMEM footprint fits the budget."""
    G = 4 * Hp
    per_t = (2 * Bt * D * 2        # bf16 x chunk, double-buffered
             + 2 * Bt * Hp * 2     # bf16 out chunk, double-buffered
             + Bt * G * 4)         # f32 gx scratch
    fixed = ((D * G + Hp * G) * 2  # single-buffered bf16 weights
             + G * 4               # bias
             + 2 * Bt * Hp * 4)    # h/c scratch
    avail = budget_bytes - fixed
    cap = max(1, avail // per_t) if avail > per_t else 1
    return _largest_divisor_leq(T, int(min(T, cap)))


def lstm_layer(x_seq, w_ih_T, w_hh_T, bias, *, vmem_budget=20 << 20):
    """x_seq: (T, Bp, D) -> hidden sequence (T, Bp, Hp) in the weight dtype."""
    T, Bp, D = x_seq.shape
    Hp = w_hh_T.shape[0]
    G = 4 * Hp
    out_dtype = w_ih_T.dtype

    # Leading 'parallel' batch-tile axis: lets a large batch split across the
    # two v7x TensorCores; single tile for small batches (no extra overhead).
    nb = 2 if (Bp >= 64 and Bp % (2 * BATCH_PAD) == 0) else 1
    Bt = Bp // nb

    tc = _pick_time_chunk(T, Bt, D, Hp, vmem_budget)
    nt = T // tc
    # Full unroll only when register pressure is low; cap otherwise.
    unroll = tc if (Hp <= 256 and tc <= 32) else max(1, min(tc, 4))

    est = (2 * tc * Bt * D * x_seq.dtype.itemsize                  # x chunk
           + 2 * tc * Bt * Hp * jnp.dtype(out_dtype).itemsize      # out chunk
           + (D * G + Hp * G) * w_ih_T.dtype.itemsize              # weights x1
           + G * 4                                                 # bias
           + tc * Bt * G * 4 + 2 * Bt * Hp * 4)                    # scratch

    flops = 2 * T * Bp * D * G + 2 * T * Bp * Hp * G + 10 * T * Bp * Hp
    bytes_accessed = (T * Bp * D * x_seq.dtype.itemsize
                      + (D * G + Hp * G) * w_ih_T.dtype.itemsize + G * 4
                      + T * Bp * Hp * jnp.dtype(out_dtype).itemsize)

    return pl.pallas_call(
        functools.partial(_lstm_layer_kernel, unroll=unroll),
        out_shape=jax.ShapeDtypeStruct((T, Bp, Hp), out_dtype),
        grid_spec=pltpu.PrefetchScalarGridSpec(
            num_scalar_prefetch=0,
            grid=(nb, nt),
            in_specs=[
                pl.BlockSpec((tc, Bt, D), lambda b, t: (t, b, 0)),
                pl.BlockSpec((D, G), lambda b, t: (0, 0),
                             pipeline_mode=pl.Buffered(1)),
                pl.BlockSpec((Hp, G), lambda b, t: (0, 0),
                             pipeline_mode=pl.Buffered(1)),
                pl.BlockSpec((1, G), lambda b, t: (0, 0),
                             pipeline_mode=pl.Buffered(1)),
            ],
            out_specs=pl.BlockSpec((tc, Bt, Hp), lambda b, t: (t, b, 0)),
            scratch_shapes=[
                pltpu.VMEM((Bt, Hp), jnp.float32),     # h carry
                pltpu.VMEM((Bt, Hp), jnp.float32),     # c carry
                pltpu.VMEM((tc, Bt, G), jnp.float32),  # staged gates
            ],
        ),
        compiler_params=pltpu.CompilerParams(
            dimension_semantics=("parallel", "arbitrary"),  # serial recurrence
            vmem_limit_bytes=_vmem_limit(est)),
        cost_estimate=pl.CostEstimate(
            flops=flops, transcendentals=5 * T * Bp * Hp,
            bytes_accessed=bytes_accessed),
    )(x_seq, w_ih_T, w_hh_T, bias)


# ------------------------------- full forward --------------------------------

def lstm_net_forward(x, params):
    """x: (T, B, input_size) f32 -> sigmoid(fc(lstm(x))): (T, B, num_objects)."""
    T, B, _ = x.shape
    Hp = params["hidden_pad"]
    O = params["num_objects"]
    Op = params["num_objects_pad"]
    Bp = _round_up(B, BATCH_PAD)
    dot_dtype = params["fc_w_T"].dtype

    # Pad batch (sublane) and cast once to the matmul dtype (halves HBM reads).
    h = jnp.pad(x, ((0, 0), (0, Bp - B), (0, 0))).astype(dot_dtype)
    for (w_ih_T, w_hh_T, bias) in params["layers"]:
        h = lstm_layer(h, w_ih_T, w_hh_T, bias)            # (T, Bp, Hp) bf16

    out = dense(h.reshape(T * Bp, Hp), params["fc_w_T"], params["fc_b"],
                activation=jax.nn.sigmoid)                  # (T*Bp, Op) f32
    return out.reshape(T, Bp, Op)[:, :B, :O]


# -------------------------------- parameters ---------------------------------

def init_params(key, input_size, hidden_size, num_layers, num_objects):
    """Raw PyTorch-style f32 params, uniform(-1/sqrt(H), 1/sqrt(H))."""
    bound = 1.0 / math.sqrt(hidden_size)
    layers = []
    for layer in range(num_layers):
        d_in = input_size if layer == 0 else hidden_size
        key, k1, k2, k3, k4 = jax.random.split(key, 5)
        w_ih = jax.random.uniform(k1, (4 * hidden_size, d_in),
                                  minval=-bound, maxval=bound, dtype=jnp.float32)
        w_hh = jax.random.uniform(k2, (4 * hidden_size, hidden_size),
                                  minval=-bound, maxval=bound, dtype=jnp.float32)
        b_ih = jax.random.uniform(k3, (4 * hidden_size,),
                                  minval=-bound, maxval=bound, dtype=jnp.float32)
        b_hh = jax.random.uniform(k4, (4 * hidden_size,),
                                  minval=-bound, maxval=bound, dtype=jnp.float32)
        layers.append((w_ih, w_hh, b_ih, b_hh))
    key, k5, k6 = jax.random.split(key, 3)
    fc_w = jax.random.uniform(k5, (num_objects, hidden_size),
                              minval=-bound, maxval=bound, dtype=jnp.float32)
    fc_b = jax.random.uniform(k6, (num_objects,),
                              minval=-bound, maxval=bound, dtype=jnp.float32)
    return {"layers": layers, "fc_w": fc_w, "fc_b": fc_b,
            "input_size": input_size, "hidden_size": hidden_size,
            "num_objects": num_objects}


_GATE_ORDER = (0, 1, 3, 2)   # PyTorch (i, f, g, o) -> kernel (i, f, o, g)


def _pad_gates(w, H, Hp):
    """Stacked gate blocks (i;f;g;o along axis 0) -> padded, reordered (i;f;o;g)."""
    pad_spec = ((0, Hp - H),) + ((0, 0),) * (w.ndim - 1)
    blocks = [jnp.pad(w[k * H:(k + 1) * H], pad_spec) for k in _GATE_ORDER]
    return jnp.concatenate(blocks, axis=0)


def prepare_params(raw, *, dot_dtype=jnp.bfloat16):
    """Pad to lane/sublane-friendly shapes, reorder gates to (i,f,o,g),
    transpose, combine biases, and cast matmul weights to dot_dtype.
    NOTE: bf16 weights deviate slightly from PyTorch f32 LSTM semantics
    (bounded by the 3e-2 check below). Padded hidden units have zero weights
    and bias, and with zero initial (h, c) their state stays exactly 0."""
    H = raw["hidden_size"]
    O = raw["num_objects"]
    Hp = _round_up(H, LANE)
    Op = _round_up(O, LANE)
    layers = []
    for idx, (w_ih, w_hh, b_ih, b_hh) in enumerate(raw["layers"]):
        d_in = w_ih.shape[1]
        d_in_p = d_in if idx == 0 else Hp
        w_ih_p = jnp.pad(_pad_gates(w_ih, H, Hp), ((0, 0), (0, d_in_p - d_in)))
        w_hh_p = jnp.pad(_pad_gates(w_hh, H, Hp), ((0, 0), (0, Hp - H)))
        b_p = _pad_gates(b_ih + b_hh, H, Hp)
        layers.append((w_ih_p.T.astype(dot_dtype),
                       w_hh_p.T.astype(dot_dtype),
                       b_p.reshape(1, 4 * Hp).astype(jnp.float32)))
    fc_w_p = jnp.pad(raw["fc_w"], ((0, Op - O), (0, Hp - H)))
    fc_b_p = jnp.pad(raw["fc_b"], (0, Op - O))
    return {"layers": layers,
            "fc_w_T": fc_w_p.T.astype(dot_dtype),
            "fc_b": fc_b_p.reshape(1, Op).astype(jnp.float32),
            "hidden_pad": Hp,
            "num_objects": O,
            "num_objects_pad": Op}


# ----------------------------- pure-JAX reference -----------------------------

def lstm_net_reference(x, params):
    """Pure-JAX reference using the same prepared (padded, reordered) params."""
    T, B, _ = x.shape
    Hp = params["hidden_pad"]
    O = params["num_objects"]
    Bp = _round_up(B, BATCH_PAD)
    h_seq = jnp.pad(x, ((0, 0), (0, Bp - B), (0, 0)))
    for (w_ih_T, w_hh_T, bias) in params["layers"]:
        gx_seq = jnp.dot(h_seq.astype(w_ih_T.dtype), w_ih_T,
                         preferred_element_type=jnp.float32) + bias

        def step(carry, gx_t, w_hh_T=w_hh_T):
            h, c = carry
            gates = gx_t + jnp.dot(h.astype(w_hh_T.dtype), w_hh_T,
                                   preferred_element_type=jnp.float32)
            sig = jax.nn.sigmoid(gates[:, :3 * Hp])
            g = jnp.tanh(gates[:, 3 * Hp:])
            i = sig[:, 0 * Hp:1 * Hp]
            f = sig[:, 1 * Hp:2 * Hp]
            o = sig[:, 2 * Hp:3 * Hp]
            c = f * c + i * g
            h = o * jnp.tanh(c)
            return (h, c), h

        init = (jnp.zeros((Bp, Hp), jnp.float32),
                jnp.zeros((Bp, Hp), jnp.float32))
        _, h_seq = lax.scan(step, init, gx_seq)
    out = jax.nn.sigmoid(
        jnp.dot(h_seq.astype(params["fc_w_T"].dtype), params["fc_w_T"],
                preferred_element_type=jnp.float32) + params["fc_b"])
    return out[:, :B, :O]


if __name__ == "__main__":
    T, B = 8, 2
    input_size, hidden_size, num_layers, num_objects = 16, 32, 2, 4

    key = jax.random.PRNGKey(0)
    key, kx = jax.random.split(key)
    x = jax.random.normal(kx, (T, B, input_size), dtype=jnp.float32)

    raw = init_params(key, input_size, hidden_size, num_layers, num_objects)

    # bf16 matmul operands + f32 accumulation / f32 elementwise.
    params = prepare_params(raw, dot_dtype=jnp.bfloat16)
    out = jax.block_until_ready(lstm_net_forward(x, params))
    assert out.shape == (T, B, num_objects)

    # Check 1: pure-JAX reference with identical (bf16-dot) math — tight.
    ref = lstm_net_reference(x, params)
    assert jnp.allclose(out, ref, atol=2e-3, rtol=2e-3), \
        float(jnp.max(jnp.abs(out - ref)))

    # Check 2: full-f32 (PyTorch-semantics) reference — bounds bf16 drift.
    params_f32 = prepare_params(raw, dot_dtype=jnp.float32)
    ref_f32 = lstm_net_reference(x, params_f32)
    assert jnp.allclose(out, ref_f32, atol=3e-2, rtol=3e-2), \
        float(jnp.max(jnp.abs(out - ref_f32)))

    print("KERNEL_OK")
</pallas_src>

<mosaic_0001>
module attributes {stable_mosaic.version = 11 : i64} {
  func.func @_lstm_layer_kernel(%arg0: i32, %arg1: i32, %arg2: memref<8x16x16xbf16, #tpu.memory_space<vmem>>, %arg3: memref<16x512xbf16, #tpu.memory_space<vmem>>, %arg4: memref<128x512xbf16, #tpu.memory_space<vmem>>, %arg5: memref<1x512xf32, #tpu.memory_space<vmem>>, %arg6: memref<8x16x128xbf16, #tpu.memory_space<vmem>>, %arg7: memref<16x128xf32, #tpu.memory_space<vmem>>, %arg8: memref<16x128xf32, #tpu.memory_space<vmem>>, %arg9: memref<8x16x512xf32, #tpu.memory_space<vmem>>) attributes {dimension_semantics = [#tpu.dimension_semantics<parallel>, #tpu.dimension_semantics<arbitrary>], iteration_bounds = array<i64: 1, 1>, scalar_prefetch = 0 : i64, scratch_operands = 3 : i64, tpu.core_type = #tpu.core_type<tc>, window_params = [{transform_indices = @transform_0, window_bounds = array<i64: 8, 16, 16>}, {pipeline_mode = #tpu.pipeline_mode<synchronous>, transform_indices = @transform_1, window_bounds = array<i64: 16, 512>}, {pipeline_mode = #tpu.pipeline_mode<synchronous>, transform_indices = @transform_2, window_bounds = array<i64: 128, 512>}, {pipeline_mode = #tpu.pipeline_mode<synchronous>, transform_indices = @transform_3, window_bounds = array<i64: 1, 512>}, {transform_indices = @transform_4, window_bounds = array<i64: 8, 16, 128>}]} {
    %c0_i32 = arith.constant 0 : i32
    %0 = arith.cmpi eq, %arg1, %c0_i32 : i32
    %1 = arith.extui %0 : i1 to i32
    %c0_i32_0 = arith.constant 0 : i32
    %2 = arith.cmpi ne, %1, %c0_i32_0 : i32
    scf.if %2 {
      %cst_83 = arith.constant 0.000000e+00 : f32
      %240 = vector.broadcast %cst_83 : f32 to vector<16x128xf32>
      %c0_84 = arith.constant 0 : index
      %c0_85 = arith.constant 0 : index
      %241 = vector.load %arg7[%c0_84, %c0_85] : memref<16x128xf32, #tpu.memory_space<vmem>>, vector<16x128xf32>
      tpu.vector_store %arg7[%c0_84, %c0_85], %240 {strides = array<i32>} : memref<16x128xf32, #tpu.memory_space<vmem>>, vector<16x128xf32>,
      %cst_86 = arith.constant 0.000000e+00 : f32
      %242 = vector.broadcast %cst_86 : f32 to vector<16x128xf32>
      %c0_87 = arith.constant 0 : index
      %c0_88 = arith.constant 0 : index
      %243 = vector.load %arg8[%c0_87, %c0_88] : memref<16x128xf32, #tpu.memory_space<vmem>>, vector<16x128xf32>
      tpu.vector_store %arg8[%c0_87, %c0_88], %242 {strides = array<i32>} : memref<16x128xf32, #tpu.memory_space<vmem>>, vector<16x128xf32>,
    } else {
    }
    %c0 = arith.constant 0 : index
    %c0_1 = arith.constant 0 : index
    %c0_2 = arith.constant 0 : index
    %3 = vector.load %arg2[%c0, %c0_1, %c0_2] : memref<8x16x16xbf16, #tpu.memory_space<vmem>>, vector<8x16x16xbf16>
    %4 = vector.shape_cast %3 : vector<8x16x16xbf16> to vector<128x16xbf16>
    %c0_3 = arith.constant 0 : index
    %c0_4 = arith.constant 0 : index
    %5 = vector.load %arg3[%c0_3, %c0_4] : memref<16x512xbf16, #tpu.memory_space<vmem>>, vector<16x512xbf16>
    %cst = arith.constant dense<0.000000e+00> : vector<128x512xf32>
    %6 = tpu.matmul %4, %5, %cst {dimension_numbers = #tpu.dot_dimension_numbers<[1], [0], [0], [1], [0, 0, 1, 1], [], []>} : vector<128x16xbf16>, vector<16x512xbf16>, vector<128x512xf32> -> vector<128x512xf32>
    %c0_5 = arith.constant 0 : index
    %c0_6 = arith.constant 0 : index
    %7 = vector.load %arg5[%c0_5, %c0_6] : memref<1x512xf32, #tpu.memory_space<vmem>>, vector<1x512xf32>
    %8 = vector.broadcast %7 : vector<1x512xf32> to vector<128x512xf32>
    %9 = arith.addf %6, %8 : vector<128x512xf32>
    %10 = vector.shape_cast %9 : vector<128x512xf32> to vector<8x16x512xf32>
    %c0_7 = arith.constant 0 : index
    %c0_8 = arith.constant 0 : index
    %c0_9 = arith.constant 0 : index
    %11 = vector.load %arg9[%c0_7, %c0_8, %c0_9] : memref<8x16x512xf32, #tpu.memory_space<vmem>>, vector<8x16x512xf32>
    tpu.vector_store %arg9[%c0_7, %c0_8, %c0_9], %10 {strides = array<i32>} : memref<8x16x512xf32, #tpu.memory_space<vmem>>, vector<8x16x512xf32>,
    %c0_10 = arith.constant 0 : index
    %c0_11 = arith.constant 0 : index
    %12 = vector.load %arg7[%c0_10, %c0_11] : memref<16x128xf32, #tpu.memory_space<vmem>>, vector<16x128xf32>
    %c0_12 = arith.constant 0 : index
    %c0_13 = arith.constant 0 : index
    %13 = vector.load %arg8[%c0_12, %c0_13] : memref<16x128xf32, #tpu.memory_space<vmem>>, vector<16x128xf32>
    %c0_i32_14 = arith.constant 0 : i32
    %14 = arith.index_cast %c0_i32_14 : i32 to index
    %c0_15 = arith.constant 0 : index
    %c0_16 = arith.constant 0 : index
    %15 = vector.load %arg9[%14, %c0_15, %c0_16] : memref<8x16x512xf32, #tpu.memory_space<vmem>>, vector<1x16x512xf32>
    %16 = vector.shape_cast %15 : vector<1x16x512xf32> to vector<16x512xf32>
    %17 = arith.truncf %12 : vector<16x128xf32> to vector<16x128xbf16>
    %c0_17 = arith.constant 0 : index
    %c0_18 = arith.constant 0 : index
    %18 = vector.load %arg4[%c0_17, %c0_18] : memref<128x512xbf16, #tpu.memory_space<vmem>>, vector<128x512xbf16>
    %cst_19 = arith.constant dense<0.000000e+00> : vector<16x512xf32>
    %19 = tpu.matmul %17, %18, %cst_19 {dimension_numbers = #tpu.dot_dimension_numbers<[1], [0], [0], [1], [0, 0, 1, 1], [], []>} : vector<16x128xbf16>, vector<128x512xbf16>, vector<16x512xf32> -> vector<16x512xf32>
    %20 = arith.addf %16, %19 : vector<16x512xf32>
    %21 = vector.extract_strided_slice %20 {offsets = [0, 0], sizes = [16, 384], strides = [1, 1]} : vector<16x512xf32> to vector<16x384xf32>
    %22 = arith.negf %21 : vector<16x384xf32>
    %23 = math.exp %22 : vector<16x384xf32>
    %cst_20 = arith.constant 1.000000e+00 : f32
    %24 = vector.broadcast %cst_20 : f32 to vector<16x384xf32>
    %25 = arith.addf %24, %23 : vector<16x384xf32>
    %26 = arith.divf %24, %25 : vector<16x384xf32>
    %27 = vector.extract_strided_slice %20 {offsets = [0, 384], sizes = [16, 128], strides = [1, 1]} : vector<16x512xf32> to vector<16x128xf32>
    %28 = math.tanh %27 : vector<16x128xf32>
    %29 = vector.extract_strided_slice %26 {offsets = [0, 0], sizes = [16, 128], strides = [1, 1]} : vector<16x384xf32> to vector<16x128xf32>
    %30 = vector.extract_strided_slice %26 {offsets = [0, 128], sizes = [16, 128], strides = [1, 1]} : vector<16x384xf32> to vector<16x128xf32>
    %31 = vector.extract_strided_slice %26 {offsets = [0, 256], sizes = [16, 128], strides = [1, 1]} : vector<16x384xf32> to vector<16x128xf32>
    %32 = arith.mulf %30, %13 : vector<16x128xf32>
    %33 = arith.mulf %29, %28 : vector<16x128xf32>
    %34 = arith.addf %32, %33 : vector<16x128xf32>
    %35 = math.tanh %34 : vector<16x128xf32>
    %36 = arith.mulf %31, %35 : vector<16x128xf32>
    %37 = arith.truncf %36 : vector<16x128xf32> to vector<16x128xbf16>
    %38 = arith.index_cast %c0_i32_14 : i32 to index
    %c0_21 = arith.constant 0 : index
    %c0_22 = arith.constant 0 : index
    %39 = vector.load %arg6[%38, %c0_21, %c0_22] : memref<8x16x128xbf16, #tpu.memory_space<vmem>>, vector<1x16x128xbf16>
    %40 = vector.shape_cast %39 : vector<1x16x128xbf16> to vector<16x128xbf16>
    %41 = vector.shape_cast %37 : vector<16x128xbf16> to vector<1x16x128xbf16>
    tpu.vector_store %arg6[%38, %c0_21, %c0_22], %41 {strides = array<i32>} : memref<8x16x128xbf16, #tpu.memory_space<vmem>>, vector<1x16x128xbf16>,
    %c1_i32 = arith.constant 1 : i32
    %42 = arith.index_cast %c1_i32 : i32 to index
    %c0_23 = arith.constant 0 : index
    %c0_24 = arith.constant 0 : index
    %43 = vector.load %arg9[%42, %c0_23, %c0_24] : memref<8x16x512xf32, #tpu.memory_space<vmem>>, vector<1x16x512xf32>
    %44 = vector.shape_cast %43 : vector<1x16x512xf32> to vector<16x512xf32>
    %45 = arith.truncf %36 : vector<16x128xf32> to vector<16x128xbf16>
    %c0_25 = arith.constant 0 : index
    %c0_26 = arith.constant 0 : index
    %46 = vector.load %arg4[%c0_25, %c0_26] : memref<128x512xbf16, #tpu.memory_space<vmem>>, vector<128x512xbf16>
    %cst_27 = arith.constant dense<0.000000e+00> : vector<16x512xf32>
    %47 = tpu.matmul %45, %46, %cst_27 {dimension_numbers = #tpu.dot_dimension_numbers<[1], [0], [0], [1], [0, 0, 1, 1], [], []>} : vector<16x128xbf16>, vector<128x512xbf16>, vector<16x512xf32> -> vector<16x512xf32>
    %48 = arith.addf %44, %47 : vector<16x512xf32>
    %49 = vector.extract_strided_slice %48 {offsets = [0, 0], sizes = [16, 384], strides = [1, 1]} : vector<16x512xf32> to vector<16x384xf32>
    %50 = arith.negf %49 : vector<16x384xf32>
    %51 = math.exp %50 : vector<16x384xf32>
    %cst_28 = arith.constant 1.000000e+00 : f32
    %52 = vector.broadcast %cst_28 : f32 to vector<16x384xf32>
    %53 = arith.addf %52, %51 : vector<16x384xf32>
    %54 = arith.divf %52, %53 : vector<16x384xf32>
    %55 = vector.extract_strided_slice %48 {offsets = [0, 384], sizes = [16, 128], strides = [1, 1]} : vector<16x512xf32> to vector<16x128xf32>
    %56 = math.tanh %55 : vector<16x128xf32>
    %57 = vector.extract_strided_slice %54 {offsets = [0, 0], sizes = [16, 128], strides = [1, 1]} : vector<16x384xf32> to vector<16x128xf32>
    %58 = vector.extract_strided_slice %54 {offsets = [0, 128], sizes = [16, 128], strides = [1, 1]} : vector<16x384xf32> to vector<16x128xf32>
    %59 = vector.extract_strided_slice %54 {offsets = [0, 256], sizes = [16, 128], strides = [1, 1]} : vector<16x384xf32> to vector<16x128xf32>
    %60 = arith.mulf %58, %34 : vector<16x128xf32>
    %61 = arith.mulf %57, %56 : vector<16x128xf32>
    %62 = arith.addf %60, %61 : vector<16x128xf32>
    %63 = math.tanh %62 : vector<16x128xf32>
    %64 = arith.mulf %59, %63 : vector<16x128xf32>
    %65 = arith.truncf %64 : vector<16x128xf32> to vector<16x128xbf16>
    %66 = arith.index_cast %c1_i32 : i32 to index
    %c0_29 = arith.constant 0 : index
    %c0_30 = arith.constant 0 : index
    %67 = vector.load %arg6[%66, %c0_29, %c0_30] : memref<8x16x128xbf16, #tpu.memory_space<vmem>>, vector<1x16x128xbf16>
    %68 = vector.shape_cast %67 : vector<1x16x128xbf16> to vector<16x128xbf16>
    %69 = vector.shape_cast %65 : vector<16x128xbf16> to vector<1x16x128xbf16>
    tpu.vector_store %arg6[%66, %c0_29, %c0_30], %69 {strides = array<i32>} : memref<8x16x128xbf16, #tpu.memory_space<vmem>>, vector<1x16x128xbf16>,
    %c2_i32 = arith.constant 2 : i32
    %70 = arith.index_cast %c2_i32 : i32 to index
    %c0_31 = arith.constant 0 : index
    %c0_32 = arith.constant 0 : index
    %71 = vector.load %arg9[%70, %c0_31, %c0_32] : memref<8x16x512xf32, #tpu.memory_space<vmem>>, vector<1x16x512xf32>
    %72 = vector.shape_cast %71 : vector<1x16x512xf32> to vector<16x512xf32>
    %73 = arith.truncf %64 : vector<16x128xf32> to vector<16x128xbf16>
    %c0_33 = arith.constant 0 : index
    %c0_34 = arith.constant 0 : index
    %74 = vector.load %arg4[%c0_33, %c0_34] : memref<128x512xbf16, #tpu.memory_space<vmem>>, vector<128x512xbf16>
    %cst_35 = arith.constant dense<0.000000e+00> : vector<16x512xf32>
    %75 = tpu.matmul %73, %74, %cst_35 {dimension_numbers = #tpu.dot_dimension_numbers<[1], [0], [0], [1], [0, 0, 1, 1], [], []>} : vector<16x128xbf16>, vector<128x512xbf16>, vector<16x512xf32> -> vector<16x512xf32>
    %76 = arith.addf %72, %75 : vector<16x512xf32>
    %77 = vector.extract_strided_slice %76 {offsets = [0, 0], sizes = [16, 384], strides = [1, 1]} : vector<16x512xf32> to vector<16x384xf32>
    %78 = arith.negf %77 : vector<16x384xf32>
    %79 = math.exp %78 : vector<16x384xf32>
    %cst_36 = arith.constant 1.000000e+00 : f32
    %80 = vector.broadcast %cst_36 : f32 to vector<16x384xf32>
    %81 = arith.addf %80, %79 : vector<16x384xf32>
    %82 = arith.divf %80, %81 : vector<16x384xf32>
    %83 = vector.extract_strided_slice %76 {offsets = [0, 384], sizes = [16, 128], strides = [1, 1]} : vector<16x512xf32> to vector<16x128xf32>
    %84 = math.tanh %83 : vector<16x128xf32>
    %85 = vector.extract_strided_slice %82 {offsets = [0, 0], sizes = [16, 128], strides = [1, 1]} : vector<16x384xf32> to vector<16x128xf32>
    %86 = vector.extract_strided_slice %82 {offsets = [0, 128], sizes = [16, 128], strides = [1, 1]} : vector<16x384xf32> to vector<16x128xf32>
    %87 = vector.extract_strided_slice %82 {offsets = [0, 256], sizes = [16, 128], strides = [1, 1]} : vector<16x384xf32> to vector<16x128xf32>
    %88 = arith.mulf %86, %62 : vector<16x128xf32>
    %89 = arith.mulf %85, %84 : vector<16x128xf32>
    %90 = arith.addf %88, %89 : vector<16x128xf32>
    %91 = math.tanh %90 : vector<16x128xf32>
    %92 = arith.mulf %87, %91 : vector<16x128xf32>
    %93 = arith.truncf %92 : vector<16x128xf32> to vector<16x128xbf16>
    %94 = arith.index_cast %c2_i32 : i32 to index
    %c0_37 = arith.constant 0 : index
    %c0_38 = arith.constant 0 : index
    %95 = vector.load %arg6[%94, %c0_37, %c0_38] : memref<8x16x128xbf16, #tpu.memory_space<vmem>>, vector<1x16x128xbf16>
    %96 = vector.shape_cast %95 : vector<1x16x128xbf16> to vector<16x128xbf16>
    %97 = vector.shape_cast %93 : vector<16x128xbf16> to vector<1x16x128xbf16>
    tpu.vector_store %arg6[%94, %c0_37, %c0_38], %97 {strides = array<i32>} : memref<8x16x128xbf16, #tpu.memory_space<vmem>>, vector<1x16x128xbf16>,
    %c3_i32 = arith.constant 3 : i32
    %98 = arith.index_cast %c3_i32 : i32 to index
    %c0_39 = arith.constant 0 : index
    %c0_40 = arith.constant 0 : index
    %99 = vector.load %arg9[%98, %c0_39, %c0_40] : memref<8x16x512xf32, #tpu.memory_space<vmem>>, vector<1x16x512xf32>
    %100 = vector.shape_cast %99 : vector<1x16x512xf32> to vector<16x512xf32>
    %101 = arith.truncf %92 : vector<16x128xf32> to vector<16x128xbf16>
    %c0_41 = arith.constant 0 : index
    %c0_42 = arith.constant 0 : index
    %102 = vector.load %arg4[%c0_41, %c0_42] : memref<128x512xbf16, #tpu.memory_space<vmem>>, vector<128x512xbf16>
    %cst_43 = arith.constant dense<0.000000e+00> : vector<16x512xf32>
    %103 = tpu.matmul %101, %102, %cst_43 {dimension_numbers = #tpu.dot_dimension_numbers<[1], [0], [0], [1], [0, 0, 1, 1], [], []>} : vector<16x128xbf16>, vector<128x512xbf16>, vector<16x512xf32> -> vector<16x512xf32>
    %104 = arith.addf %100, %103 : vector<16x512xf32>
    %105 = vector.extract_strided_slice %104 {offsets = [0, 0], sizes = [16, 384], strides = [1, 1]} : vector<16x512xf32> to vector<16x384xf32>
    %106 = arith.negf %105 : vector<16x384xf32>
    %107 = math.exp %106 : vector<16x384xf32>
    %cst_44 = arith.constant 1.000000e+00 : f32
    %108 = vector.broadcast %cst_44 : f32 to vector<16x384xf32>
    %109 = arith.addf %108, %107 : vector<16x384xf32>
    %110 = arith.divf %108, %109 : vector<16x384xf32>
    %111 = vector.extract_strided_slice %104 {offsets = [0, 384], sizes = [16, 128], strides = [1, 1]} : vector<16x512xf32> to vector<16x128xf32>
    %112 = math.tanh %111 : vector<16x128xf32>
    %113 = vector.extract_strided_slice %110 {offsets = [0, 0], sizes = [16, 128], strides = [1, 1]} : vector<16x384xf32> to vector<16x128xf32>
    %114 = vector.extract_strided_slice %110 {offsets = [0, 128], sizes = [16, 128], strides = [1, 1]} : vector<16x384xf32> to vector<16x128xf32>
    %115 = vector.extract_strided_slice %110 {offsets = [0, 256], sizes = [16, 128], strides = [1, 1]} : vector<16x384xf32> to vector<16x128xf32>
    %116 = arith.mulf %114, %90 : vector<16x128xf32>
    %117 = arith.mulf %113, %112 : vector<16x128xf32>
    %118 = arith.addf %116, %117 : vector<16x128xf32>
    %119 = math.tanh %118 : vector<16x128xf32>
    %120 = arith.mulf %115, %119 : vector<16x128xf32>
    %121 = arith.truncf %120 : vector<16x128xf32> to vector<16x128xbf16>
    %122 = arith.index_cast %c3_i32 : i32 to index
    %c0_45 = arith.constant 0 : index
    %c0_46 = arith.constant 0 : index
    %123 = vector.load %arg6[%122, %c0_45, %c0_46] : memref<8x16x128xbf16, #tpu.memory_space<vmem>>, vector<1x16x128xbf16>
    %124 = vector.shape_cast %123 : vector<1x16x128xbf16> to vector<16x128xbf16>
    %125 = vector.shape_cast %121 : vector<16x128xbf16> to vector<1x16x128xbf16>
    tpu.vector_store %arg6[%122, %c0_45, %c0_46], %125 {strides = array<i32>} : memref<8x16x128xbf16, #tpu.memory_space<vmem>>, vector<1x16x128xbf16>,
    %c4_i32 = arith.constant 4 : i32
    %126 = arith.index_cast %c4_i32 : i32 to index
    %c0_47 = arith.constant 0 : index
    %c0_48 = arith.constant 0 : index
    %127 = vector.load %arg9[%126, %c0_47, %c0_48] : memref<8x16x512xf32, #tpu.memory_space<vmem>>, vector<1x16x512xf32>
    %128 = vector.shape_cast %127 : vector<1x16x512xf32> to vector<16x512xf32>
    %129 = arith.truncf %120 : vector<16x128xf32> to vector<16x128xbf16>
    %c0_49 = arith.constant 0 : index
    %c0_50 = arith.constant 0 : index
    %130 = vector.load %arg4[%c0_49, %c0_50] : memref<128x512xbf16, #tpu.memory_space<vmem>>, vector<128x512xbf16>
    %cst_51 = arith.constant dense<0.000000e+00> : vector<16x512xf32>
    %131 = tpu.matmul %129, %130, %cst_51 {dimension_numbers = #tpu.dot_dimension_numbers<[1], [0], [0], [1], [0, 0, 1, 1], [], []>} : vector<16x128xbf16>, vector<128x512xbf16>, vector<16x512xf32> -> vector<16x512xf32>
    %132 = arith.addf %128, %131 : vector<16x512xf32>
    %133 = vector.extract_strided_slice %132 {offsets = [0, 0], sizes = [16, 384], strides = [1, 1]} : vector<16x512xf32> to vector<16x384xf32>
    %134 = arith.negf %133 : vector<16x384xf32>
    %135 = math.exp %134 : vector<16x384xf32>
    %cst_52 = arith.constant 1.000000e+00 : f32
    %136 = vector.broadcast %cst_52 : f32 to vector<16x384xf32>
    %137 = arith.addf %136, %135 : vector<16x384xf32>
    %138 = arith.divf %136, %137 : vector<16x384xf32>
    %139 = vector.extract_strided_slice %132 {offsets = [0, 384], sizes = [16, 128], strides = [1, 1]} : vector<16x512xf32> to vector<16x128xf32>
    %140 = math.tanh %139 : vector<16x128xf32>
    %141 = vector.extract_strided_slice %138 {offsets = [0, 0], sizes = [16, 128], strides = [1, 1]} : vector<16x384xf32> to vector<16x128xf32>
    %142 = vector.extract_strided_slice %138 {offsets = [0, 128], sizes = [16, 128], strides = [1, 1]} : vector<16x384xf32> to vector<16x128xf32>
    %143 = vector.extract_strided_slice %138 {offsets = [0, 256], sizes = [16, 128], strides = [1, 1]} : vector<16x384xf32> to vector<16x128xf32>
    %144 = arith.mulf %142, %118 : vector<16x128xf32>
    %145 = arith.mulf %141, %140 : vector<16x128xf32>
    %146 = arith.addf %144, %145 : vector<16x128xf32>
    %147 = math.tanh %146 : vector<16x128xf32>
    %148 = arith.mulf %143, %147 : vector<16x128xf32>
    %149 = arith.truncf %148 : vector<16x128xf32> to vector<16x128xbf16>
    %150 = arith.index_cast %c4_i32 : i32 to index
    %c0_53 = arith.constant 0 : index
    %c0_54 = arith.constant 0 : index
    %151 = vector.load %arg6[%150, %c0_53, %c0_54] : memref<8x16x128xbf16, #tpu.memory_space<vmem>>, vector<1x16x128xbf16>
    %152 = vector.shape_cast %151 : vector<1x16x128xbf16> to vector<16x128xbf16>
    %153 = vector.shape_cast %149 : vector<16x128xbf16> to vector<1x16x128xbf16>
    tpu.vector_store %arg6[%150, %c0_53, %c0_54], %153 {strides = array<i32>} : memref<8x16x128xbf16, #tpu.memory_space<vmem>>, vector<1x16x128xbf16>,
    %c5_i32 = arith.constant 5 : i32
    %154 = arith.index_cast %c5_i32 : i32 to index
    %c0_55 = arith.constant 0 : index
    %c0_56 = arith.constant 0 : index
    %155 = vector.load %arg9[%154, %c0_55, %c0_56] : memref<8x16x512xf32, #tpu.memory_space<vmem>>, vector<1x16x512xf32>
    %156 = vector.shape_cast %155 : vector<1x16x512xf32> to vector<16x512xf32>
    %157 = arith.truncf %148 : vector<16x128xf32> to vector<16x128xbf16>
    %c0_57 = arith.constant 0 : index
    %c0_58 = arith.constant 0 : index
    %158 = vector.load %arg4[%c0_57, %c0_58] : memref<128x512xbf16, #tpu.memory_space<vmem>>, vector<128x512xbf16>
    %cst_59 = arith.constant dense<0.000000e+00> : vector<16x512xf32>
    %159 = tpu.matmul %157, %158, %cst_59 {dimension_numbers = #tpu.dot_dimension_numbers<[1], [0], [0], [1], [0, 0, 1, 1], [], []>} : vector<16x128xbf16>, vector<128x512xbf16>, vector<16x512xf32> -> vector<16x512xf32>
    %160 = arith.addf %156, %159 : vector<16x512xf32>
    %161 = vector.extract_strided_slice %160 {offsets = [0, 0], sizes = [16, 384], strides = [1, 1]} : vector<16x512xf32> to vector<16x384xf32>
    %162 = arith.negf %161 : vector<16x384xf32>
    %163 = math.exp %162 : vector<16x384xf32>
    %cst_60 = arith.constant 1.000000e+00 : f32
    %164 = vector.broadcast %cst_60 : f32 to vector<16x384xf32>
    %165 = arith.addf %164, %163 : vector<16x384xf32>
    %166 = arith.divf %164, %165 : vector<16x384xf32>
    %167 = vector.extract_strided_slice %160 {offsets = [0, 384], sizes = [16, 128], strides = [1, 1]} : vector<16x512xf32> to vector<16x128xf32>
    %168 = math.tanh %167 : vector<16x128xf32>
    %169 = vector.extract_strided_slice %166 {offsets = [0, 0], sizes = [16, 128], strides = [1, 1]} : vector<16x384xf32> to vector<16x128xf32>
    %170 = vector.extract_strided_slice %166 {offsets = [0, 128], sizes = [16, 128], strides = [1, 1]} : vector<16x384xf32> to vector<16x128xf32>
    %171 = vector.extract_strided_slice %166 {offsets = [0, 256], sizes = [16, 128], strides = [1, 1]} : vector<16x384xf32> to vector<16x128xf32>
    %172 = arith.mulf %170, %146 : vector<16x128xf32>
    %173 = arith.mulf %169, %168 : vector<16x128xf32>
    %174 = arith.addf %172, %173 : vector<16x128xf32>
    %175 = math.tanh %174 : vector<16x128xf32>
    %176 = arith.mulf %171, %175 : vector<16x128xf32>
    %177 = arith.truncf %176 : vector<16x128xf32> to vector<16x128xbf16>
    %178 = arith.index_cast %c5_i32 : i32 to index
    %c0_61 = arith.constant 0 : index
    %c0_62 = arith.constant 0 : index
    %179 = vector.load %arg6[%178, %c0_61, %c0_62] : memref<8x16x128xbf16, #tpu.memory_space<vmem>>, vector<1x16x128xbf16>
    %180 = vector.shape_cast %179 : vector<1x16x128xbf16> to vector<16x128xbf16>
    %181 = vector.shape_cast %177 : vector<16x128xbf16> to vector<1x16x128xbf16>
    tpu.vector_store %arg6[%178, %c0_61, %c0_62], %181 {strides = array<i32>} : memref<8x16x128xbf16, #tpu.memory_space<vmem>>, vector<1x16x128xbf16>,
    %c6_i32 = arith.constant 6 : i32
    %182 = arith.index_cast %c6_i32 : i32 to index
    %c0_63 = arith.constant 0 : index
    %c0_64 = arith.constant 0 : index
    %183 = vector.load %arg9[%182, %c0_63, %c0_64] : memref<8x16x512xf32, #tpu.memory_space<vmem>>, vector<1x16x512xf32>
    %184 = vector.shape_cast %183 : vector<1x16x512xf32> to vector<16x512xf32>
    %185 = arith.truncf %176 : vector<16x128xf32> to vector<16x128xbf16>
    %c0_65 = arith.constant 0 : index
    %c0_66 = arith.constant 0 : index
    %186 = vector.load %arg4[%c0_65, %c0_66] : memref<128x512xbf16, #tpu.memory_space<vmem>>, vector<128x512xbf16>
    %cst_67 = arith.constant dense<0.000000e+00> : vector<16x512xf32>
    %187 = tpu.matmul %185, %186, %cst_67 {dimension_numbers = #tpu.dot_dimension_numbers<[1], [0], [0], [1], [0, 0, 1, 1], [], []>} : vector<16x128xbf16>, vector<128x512xbf16>, vector<16x512xf32> -> vector<16x512xf32>
    %188 = arith.addf %184, %187 : vector<16x512xf32>
    %189 = vector.extract_strided_slice %188 {offsets = [0, 0], sizes = [16, 384], strides = [1, 1]} : vector<16x512xf32> to vector<16x384xf32>
    %190 = arith.negf %189 : vector<16x384xf32>
    %191 = math.exp %190 : vector<16x384xf32>
    %cst_68 = arith.constant 1.000000e+00 : f32
    %192 = vector.broadcast %cst_68 : f32 to vector<16x384xf32>
    %193 = arith.addf %192, %191 : vector<16x384xf32>
    %194 = arith.divf %192, %193 : vector<16x384xf32>
    %195 = vector.extract_strided_slice %188 {offsets = [0, 384], sizes = [16, 128], strides = [1, 1]} : vector<16x512xf32> to vector<16x128xf32>
    %196 = math.tanh %195 : vector<16x128xf32>
    %197 = vector.extract_strided_slice %194 {offsets = [0, 0], sizes = [16, 128], strides = [1, 1]} : vector<16x384xf32> to vector<16x128xf32>
    %198 = vector.extract_strided_slice %194 {offsets = [0, 128], sizes = [16, 128], strides = [1, 1]} : vector<16x384xf32> to vector<16x128xf32>
    %199 = vector.extract_strided_slice %194 {offsets = [0, 256], sizes = [16, 128], strides = [1, 1]} : vector<16x384xf32> to vector<16x128xf32>
    %200 = arith.mulf %198, %174 : vector<16x128xf32>
    %201 = arith.mulf %197, %196 : vector<16x128xf32>
    %202 = arith.addf %200, %201 : vector<16x128xf32>
    %203 = math.tanh %202 : vector<16x128xf32>
    %204 = arith.mulf %199, %203 : vector<16x128xf32>
    %205 = arith.truncf %204 : vector<16x128xf32> to vector<16x128xbf16>
    %206 = arith.index_cast %c6_i32 : i32 to index
    %c0_69 = arith.constant 0 : index
    %c0_70 = arith.constant 0 : index
    %207 = vector.load %arg6[%206, %c0_69, %c0_70] : memref<8x16x128xbf16, #tpu.memory_space<vmem>>, vector<1x16x128xbf16>
    %208 = vector.shape_cast %207 : vector<1x16x128xbf16> to vector<16x128xbf16>
    %209 = vector.shape_cast %205 : vector<16x128xbf16> to vector<1x16x128xbf16>
    tpu.vector_store %arg6[%206, %c0_69, %c0_70], %209 {strides = array<i32>} : memref<8x16x128xbf16, #tpu.memory_space<vmem>>, vector<1x16x128xbf16>,
    %c7_i32 = arith.constant 7 : i32
    %210 = arith.index_cast %c7_i32 : i32 to index
    %c0_71 = arith.constant 0 : index
    %c0_72 = arith.constant 0 : index
    %211 = vector.load %arg9[%210, %c0_71, %c0_72] : memref<8x16x512xf32, #tpu.memory_space<vmem>>, vector<1x16x512xf32>
    %212 = vector.shape_cast %211 : vector<1x16x512xf32> to vector<16x512xf32>
    %213 = arith.truncf %204 : vector<16x128xf32> to vector<16x128xbf16>
    %c0_73 = arith.constant 0 : index
    %c0_74 = arith.constant 0 : index
    %214 = vector.load %arg4[%c0_73, %c0_74] : memref<128x512xbf16, #tpu.memory_space<vmem>>, vector<128x512xbf16>
    %cst_75 = arith.constant dense<0.000000e+00> : vector<16x512xf32>
    %215 = tpu.matmul %213, %214, %cst_75 {dimension_numbers = #tpu.dot_dimension_numbers<[1], [0], [0], [1], [0, 0, 1, 1], [], []>} : vector<16x128xbf16>, vector<128x512xbf16>, vector<16x512xf32> -> vector<16x512xf32>
    %216 = arith.addf %212, %215 : vector<16x512xf32>
    %217 = vector.extract_strided_slice %216 {offsets = [0, 0], sizes = [16, 384], strides = [1, 1]} : vector<16x512xf32> to vector<16x384xf32>
    %218 = arith.negf %217 : vector<16x384xf32>
    %219 = math.exp %218 : vector<16x384xf32>
    %cst_76 = arith.constant 1.000000e+00 : f32
    %220 = vector.broadcast %cst_76 : f32 to vector<16x384xf32>
    %221 = arith.addf %220, %219 : vector<16x384xf32>
    %222 = arith.divf %220, %221 : vector<16x384xf32>
    %223 = vector.extract_strided_slice %216 {offsets = [0, 384], sizes = [16, 128], strides = [1, 1]} : vector<16x512xf32> to vector<16x128xf32>
    %224 = math.tanh %223 : vector<16x128xf32>
    %225 = vector.extract_strided_slice %222 {offsets = [0, 0], sizes = [16, 128], strides = [1, 1]} : vector<16x384xf32> to vector<16x128xf32>
    %226 = vector.extract_strided_slice %222 {offsets = [0, 128], sizes = [16, 128], strides = [1, 1]} : vector<16x384xf32> to vector<16x128xf32>
    %227 = vector.extract_strided_slice %222 {offsets = [0, 256], sizes = [16, 128], strides = [1, 1]} : vector<16x384xf32> to vector<16x128xf32>
    %228 = arith.mulf %226, %202 : vector<16x128xf32>
    %229 = arith.mulf %225, %224 : vector<16x128xf32>
    %230 = arith.addf %228, %229 : vector<16x128xf32>
    %231 = math.tanh %230 : vector<16x128xf32>
    %232 = arith.mulf %227, %231 : vector<16x128xf32>
    %233 = arith.truncf %232 : vector<16x128xf32> to vector<16x128xbf16>
    %234 = arith.index_cast %c7_i32 : i32 to index
    %c0_77 = arith.constant 0 : index
    %c0_78 = arith.constant 0 : index
    %235 = vector.load %arg6[%234, %c0_77, %c0_78] : memref<8x16x128xbf16, #tpu.memory_space<vmem>>, vector<1x16x128xbf16>
    %236 = vector.shape_cast %235 : vector<1x16x128xbf16> to vector<16x128xbf16>
    %237 = vector.shape_cast %233 : vector<16x128xbf16> to vector<1x16x128xbf16>
    tpu.vector_store %arg6[%234, %c0_77, %c0_78], %237 {strides = array<i32>} : memref<8x16x128xbf16, #tpu.memory_space<vmem>>, vector<1x16x128xbf16>,
    %c8_i32 = arith.constant 8 : i32
    %c0_79 = arith.constant 0 : index
    %c0_80 = arith.constant 0 : index
    %238 = vector.load %arg7[%c0_79, %c0_80] : memref<16x128xf32, #tpu.memory_space<vmem>>, vector<16x128xf32>
    tpu.vector_store %arg7[%c0_79, %c0_80], %232 {strides = array<i32>} : memref<16x128xf32, #tpu.memory_space<vmem>>, vector<16x128xf32>,
    %c0_81 = arith.constant 0 : index
    %c0_82 = arith.constant 0 : index
    %239 = vector.load %arg8[%c0_81, %c0_82] : memref<16x128xf32, #tpu.memory_space<vmem>>, vector<16x128xf32>
    tpu.vector_store %arg8[%c0_81, %c0_82], %230 {strides = array<i32>} : memref<16x128xf32, #tpu.memory_space<vmem>>, vector<16x128xf32>,
    return
  }
  func.func @transform_0(%arg0: i32, %arg1: i32) -> (i32, i32, i32) {
    %c0_i32 = arith.constant 0 : i32
    %c0_i32_0 = arith.constant 0 : i32
    return %arg1, %arg0, %c0_i32 : i32, i32, i32
  }
  func.func @transform_1(%arg0: i32, %arg1: i32) -> (i32, i32) {
    %c0_i32 = arith.constant 0 : i32
    %c0_i32_0 = arith.constant 0 : i32
    %c0_i32_1 = arith.constant 0 : i32
    return %c0_i32, %c0_i32_0 : i32, i32
  }
  func.func @transform_2(%arg0: i32, %arg1: i32) -> (i32, i32) {
    %c0_i32 = arith.constant 0 : i32
    %c0_i32_0 = arith.constant 0 : i32
    %c0_i32_1 = arith.constant 0 : i32
    return %c0_i32, %c0_i32_0 : i32, i32
  }
  func.func @transform_3(%arg0: i32, %arg1: i32) -> (i32, i32) {
    %c0_i32 = arith.constant 0 : i32
    %c0_i32_0 = arith.constant 0 : i32
    %c0_i32_1 = arith.constant 0 : i32
    return %c0_i32, %c0_i32_0 : i32, i32
  }
  func.func @transform_4(%arg0: i32, %arg1: i32) -> (i32, i32, i32) {
    %c0_i32 = arith.constant 0 : i32
    %c0_i32_0 = arith.constant 0 : i32
    return %arg1, %arg0, %c0_i32 : i32, i32, i32
  }
}

</mosaic_0001>

<bundles_post_ra>
// kernel: tpu_custom_call.1
= control target key start
LH: loop header
LB: loop body
LE: loop exit
PB: predicated region body
PF: predicated region fallthrough
CT: control target
= control target key end

     0   :  { %9 = vsyncpa [#allocation6], 0  ;;  %s5032_s0 = inlined_call_operand.hbm [shape: bf16[8,16,16], index: 0, kind: input, shape index: {}]   ;;  %s5033_s1 = inlined_call_operand.hbm [shape: bf16[16,512], index: 1, kind: input, shape index: {}]   ;;  %s5034_s2 = inlined_call_operand.hbm [shape: bf16[128,512], index: 2, kind: input, shape index: {}]   ;;  %s5035_s3 = inlined_call_operand.vmem [shape: f32[1,512], index: 3, kind: input, shape index: {}]   ;;  %s5036_s4 = inlined_call_operand.hbm [shape: bf16[8,16,128], index: 4, kind: output, shape index: {}]  }
   0x1   :  { %10 = vsyncpa [#allocation9], 0 }
   0x2   :  { %11 = vsyncpa [#allocation7], 0  ;;  %s4256_s15 = smov [#allocation8]  }
   0x3   :  { %s29_s16 = sshll.u32 %s4256_s15, 4  ;;  %s30_s16 = int_to_ptr.vmem [resolvable:$true] %s29_s16 }
   0x4   :  { %s4178_s17 = scalar_lea.vmem %s30_s16, 512  ;;  %p4183_p1 = scmp.lt.s32.totalorder %s30_s16, %s30_s16 }
   0x5   :  { %p4179_p0 = scmp.ne.s32.totalorder %s30_s16, %s4178_s17  ;;  %p4184_p2 = scmp.lt.s32.totalorder %s4178_s17, %s4178_s17 }
   0x7   :  { %p4185_p3 = por %p4184_p2, %p4183_p1 }
   0x9   :  { %p4186_p4 = pnand %p4185_p3, %p4179_p0 }
   0xb   :  { %4189 = shalt.err (!%p4186_p4)
}
   0xc   :  { %s4257_s18 = smov 256   ;;  %s4258_s19 = smov 16  }
   0xd   :  { %35 = dma.hbm_to_vmem [thread:$0]  %s5033_s1, 512, %s30_s16, [#allocation9], %s4257_s18, %s4257_s18, %s4258_s19  }
   0xe   :  { %s4259_s22 = smov [#allocation5]  }
   0xf   :  { %s17_s23 = sshll.u32 %s4259_s22, 4  ;;  %s18_s23 = int_to_ptr.vmem [resolvable:$true] %s17_s23 }
  0x10   :  { %s4198_s24 = scalar_lea.vmem %s18_s23, 1024  ;;  %p4203_p6 = scmp.lt.s32.totalorder %s18_s23, %s18_s23 }
  0x11   :  { %p4199_p5 = scmp.ne.s32.totalorder %s18_s23, %s4198_s24  ;;  %p4204_p7 = scmp.lt.s32.totalorder %s4198_s24, %s4198_s24 }
  0x13   :  { %p4205_p8 = por %p4204_p7, %p4203_p6 }
  0x15   :  { %p4206_p9 = pnand %p4205_p8, %p4199_p5 }
  0x17   :  { %4209 = shalt.err (!%p4206_p9)
}
  0x18   :  { %s4260_s25 = smov 64   ;;  %s4261_s26 = smov 4  }
  0x19   :  { %23 = dma.hbm_to_vmem [thread:$0]  %s5032_s0, 1024, %s18_s23, [#allocation6], %s4260_s25, %s4260_s25, %s4261_s26  }
  0x1a   :  { %s4262_s1 = smov [#allocation10]  }
  0x1b   :  { %s41_s29 = sshll.u32 %s4262_s1, 4  ;;  %s42_s29 = int_to_ptr.vmem [resolvable:$true] %s41_s29 }
  0x1c   :  { %s4218_s30 = scalar_lea.vmem %s42_s29, 4096  ;;  %p4223_p11 = scmp.lt.s32.totalorder %s42_s29, %s42_s29 }
  0x1d   :  { %p4219_p10 = scmp.ne.s32.totalorder %s42_s29, %s4218_s30  ;;  %p4224_p12 = scmp.lt.s32.totalorder %s4218_s30, %s4218_s30 }
  0x1f   :  { %p4225_p13 = por %p4224_p12, %p4223_p11 }
  0x21   :  { %p4226_p0 = pnand %p4225_p13, %p4219_p10 }
  0x23   :  { %4229 = shalt.err (!%p4226_p0)
}
  0x24   :  { %47 = dma.hbm_to_vmem [thread:$0]  %s5034_s2, 4096, %s42_s29, [#allocation9], %s4257_s18, %s4257_s18, %s4258_s19  }
  0x25   :  { %4250 = dma.done.wait [#allocation6], 1024  }
  0x26   :  { %4251 = vsyncadd [#allocation6], 4294966272 }
  0x27   :  { %4252 = dma.done.wait [#allocation9], 4608  }
  0x28   :  { %4253 = vsyncadd [#allocation9], 4294962688  ;;  %v5037_v0 = vmov 0   ;;  %v3756_v1 = vld [vmem:[#allocation8 + $0x4] ss:$16 sps:$4 sm:$0xff]   ;;  %vm170_vm0 = vcmask 130048   ;;  %v90_v46 = vlaneseq }
  0x29   :  { %227 = vmatprep.mubr.bf16.mxu0 %v5037_v0  ;;  %340 = vmatprep.mubr.bf16.mxu1 %v5037_v0  ;;  %v3758_v2 = vld [vmem:[#allocation8 + $0xc] ss:$16 sps:$4 sm:$0xff]   ;;  %v3760_v3 = vld [vmem:[#allocation8] ss:$16 sps:$4 sm:$0xff]   ;;  %v3761_v4 = vld [vmem:[#allocation8 + $0x8] ss:$16 sps:$4 sm:$0xff]  }
  0x2a   :  { %209 = vmatprep.subr.bf16.mxu0 %v3756_v1  ;;  %322 = vmatprep.subr.bf16.mxu1 %v3758_v2  ;;  %v3762_v5 = vld [vmem:[#allocation5] sm:$0xff]   ;;  %v4322_v11 = vld [vmem:[#allocation10 + $0xe8] ss:$16 sps:$4 sm:$0xff]   ;;  %v4324_v12 = vld [vmem:[#allocation10 + $0xec] ss:$16 sps:$4 sm:$0xff]   ;;  %v4264_v45 = vmov 0.0|0.0  }
  0x2b   :  { %210 = vmatpush1.bf16.msra.mxu0 %v3760_v3  ;;  %323 = vmatpush1.bf16.msra.mxu1 %v3761_v4  ;;  %v4305_v6 = vld [vmem:[#allocation10 + $0xe0] ss:$16 sps:$4 sm:$0xff]   ;;  %v4307_v7 = vld [vmem:[#allocation10 + $0xe4] ss:$16 sps:$4 sm:$0xff]   ;;  %v3766_v13 = vld [vmem:[#allocation5 + $0x8] sm:$0xff]   ;;  %v91_v47 = vshrl.u32 %v90_v46, 7 }
  0x2c   :  { %690 = vmatprep.subr.bf16.mxu0 %v4307_v7  ;;  %v4312_v8 = vld [vmem:[#allocation10 + $0xc4] ss:$16 sps:$4 sm:$0xff]   ;;  %v4316_v9 = vld [vmem:[#allocation10 + $0xc0] ss:$16 sps:$4 sm:$0xff]   ;;  %733 = vmatprep.subr.bf16.mxu1 %v4324_v12  ;;  %v4334_v16 = vld [vmem:[#allocation10 + $0xc8] ss:$16 sps:$4 sm:$0xff]  }
  0x2d   :  { %v4320_v10 = vld [vmem:[#allocation10 + $0xa4] ss:$16 sps:$4 sm:$0xff]   ;;  %v4327_v14 = vld [vmem:[#allocation10 + $0xa0] ss:$16 sps:$4 sm:$0xff]   ;;  %v4336_v17 = vld [vmem:[#allocation10 + $0xcc] ss:$16 sps:$4 sm:$0xff]  }
  0x2e   :  { %3354 = vmatmul.mubr.msk.bf16.vlgmr.msra.gmra.mxu0 %vm170_vm0, %v3762_v5  ;;  %3362 = vmatmul.mubr.msk.bf16.vlgmr.msra.gmra.mxu1 %vm170_vm0, %v3762_v5  ;;  %v4332_v15 = vld [vmem:[#allocation10 + $0x84] ss:$16 sps:$4 sm:$0xff]   ;;  %v4342_v18 = vld [vmem:[#allocation10 + $0x80] ss:$16 sps:$4 sm:$0xff]   ;;  %v4348_v20 = vld [vmem:[#allocation10 + $0xa8] ss:$16 sps:$4 sm:$0xff]  }
  0x2f   :  { %691 = vmatpush1.bf16.msra.mxu0 %v4305_v6  ;;  %237 = vmatprep.mubr.bf16.mxu0 %v5037_v0  ;;  %v4344_v19 = vld [vmem:[#allocation10 + $0x64] ss:$16 sps:$4 sm:$0xff]   ;;  %v4352_v21 = vld [vmem:[#allocation10 + $0xac] ss:$16 sps:$4 sm:$0xff]   ;;  %v4354_v23 = vld [vmem:[#allocation10 + $0x60] ss:$16 sps:$4 sm:$0xff]  }
  0x30   :  { %350 = vmatprep.mubr.bf16.mxu1 %v5037_v0  ;;  %692 = vmatprep.subr.bf16.mxu0 %v4312_v8  ;;  %v3770_v22 = vld [vmem:[#allocation5 + $0x10] sm:$0xff]   ;;  %v4360_v25 = vld [vmem:[#allocation10 + $0x8c] ss:$16 sps:$4 sm:$0xff]   ;;  %v4364_v26 = vld [vmem:[#allocation10 + $0x88] ss:$16 sps:$4 sm:$0xff]   ;;  %v92_v52 = vsub.s32 0, %v91_v47 }
  0x31   :  { %734 = vmatpush1.bf16.msra.mxu1 %v4322_v11  ;;  %v4358_v24 = vld [vmem:[#allocation10 + $0x44] ss:$16 sps:$4 sm:$0xff]   ;;  %v4371_v27 = vld [vmem:[#allocation10 + $0x40] ss:$16 sps:$4 sm:$0xff]   ;;  %v4374_v28 = vld [vmem:[#allocation10 + $0x6c] ss:$16 sps:$4 sm:$0xff]  }
  0x32   :  { %735 = vmatprep.subr.bf16.mxu1 %v4336_v17  ;;  %v4378_v29 = vld [vmem:[#allocation10 + $0x24] ss:$16 sps:$4 sm:$0xff]   ;;  %v4380_v30 = vld [vmem:[#allocation10 + $0x68] ss:$16 sps:$4 sm:$0xff]   ;;  %v4383_v32 = vld [vmem:[#allocation10 + $0x20] ss:$16 sps:$4 sm:$0xff]  }
  0x33   :  { %693 = vmatpush1.bf16.msra.mxu0 %v4316_v9  ;;  %v3777_v31 = vld [vmem:[#allocation5 + $0x18] sm:$0xff]   ;;  %v4392_v35 = vld [vmem:[#allocation10 + $0x4] ss:$16 sps:$4 sm:$0xff]   ;;  %v4396_v36 = vld [vmem:[#allocation10] ss:$16 sps:$4 sm:$0xff]   ;;  %v100_v53 = vsub.s32 2, %v91_v47 }
  0x34   :  { %694 = vmatprep.subr.bf16.mxu0 %v4320_v10  ;;  %v4386_v33 = vld [vmem:[#allocation10 + $0x4c] ss:$16 sps:$4 sm:$0xff]   ;;  %v4390_v34 = vld [vmem:[#allocation10 + $0x48] ss:$16 sps:$4 sm:$0xff]   ;;  %v3784_v39 = vld [vmem:[#allocation5 + $0x20] sm:$0xff]   ;;  %v96_v57 = vsub.s32 1, %v91_v47 }
  0x35   :  { %736 = vmatpush1.bf16.msra.mxu1 %v4334_v16  ;;  %v4398_v37 = vld [vmem:[#allocation10 + $0x2c] ss:$16 sps:$4 sm:$0xff]   ;;  %v4402_v38 = vld [vmem:[#allocation10 + $0x28] ss:$16 sps:$4 sm:$0xff]   ;;  %v3798_v43 = vld [vmem:[#allocation5 + $0x30] sm:$0xff]   ;;  %v104_v58 = vsub.s32 3, %v91_v47 }
  0x36   :  { %3355 = vmatmul.mubr.msk.bf16.gmra.mxu0 %vm170_vm0, %v3766_v13  ;;  %3363 = vmatmul.mubr.msk.bf16.gmra.mxu1 %vm170_vm0, %v3766_v13  ;;  %v4409_v40 = vld [vmem:[#allocation10 + $0xc] ss:$16 sps:$4 sm:$0xff]   ;;  %v4411_v41 = vld [vmem:[#allocation10 + $0x8] ss:$16 sps:$4 sm:$0xff]   ;;  %v88_v54 = vld [vmem:[%s5035_s3] sm:$0xf] }
  0x37   :  { %247 = vmatprep.mubr.bf16.mxu0 %v5037_v0  ;;  %360 = vmatprep.mubr.bf16.mxu1 %v5037_v0  ;;  %v3791_v42 = vld [vmem:[#allocation5 + $0x28] sm:$0xff]   ;;  %v3808_v44 = vld [vmem:[#allocation5 + $0x38] sm:$0xff]   ;;  %v4488_v61 = vrot.slane %v88_v54, %v92_v52  ;;  %v4490_v62 = vrot.slane %v88_v54, %v100_v53  ;;  %v4492_v2 = vrot.slane %v88_v54, %v96_v57  ;;  %s4265_s3 = smov [#allocation11]  }
  0x38   :  { %695 = vmatpush1.bf16.msra.mxu0 %v4327_v14  ;;  %737 = vmatprep.subr.bf16.mxu1 %v4352_v21  ;;  %v4494_v3 = vrot.slane %v88_v54, %v104_v58  ;;  %s3329_s7 = sshll.u32 %s4265_s3, 4  ;;  %s3330_s7 = int_to_ptr.vmem [resolvable:$true] %s3329_s7 }
  0x39   :  { %696 = vmatprep.subr.bf16.mxu0 %v4332_v15  ;;  %738 = vmatpush1.bf16.msra.mxu1 %v4348_v20  ;;  %s4230_s8 = scalar_lea.vmem %s3330_s7, 1024  ;;  %p4235_p2 = scmp.lt.s32.totalorder %s3330_s7, %s3330_s7 }
  0x3a   :  { %739 = vmatprep.subr.bf16.mxu1 %v4360_v25  ;;  %p4231_p1 = scmp.ne.s32.totalorder %s3330_s7, %s4230_s8  ;;  %p4236_p3 = scmp.lt.s32.totalorder %s4230_s8, %s4230_s8 }
  0x3c   :  { %697 = vmatpush1.bf16.msra.mxu0 %v4342_v18  ;;  %p4237_p4 = por %p4236_p3, %p4235_p2 }
  0x3d   :  { %698 = vmatprep.subr.bf16.mxu0 %v4344_v19  ;;  %740 = vmatpush1.bf16.msra.mxu1 %v4364_v26 }
  0x3e   :  { %3356 = vmatmul.mubr.msk.bf16.gmra.mxu0 %vm170_vm0, %v3770_v22  ;;  %3364 = vmatmul.mubr.msk.bf16.gmra.mxu1 %vm170_vm0, %v3770_v22  ;;  %p4238_p5 = pnand %p4237_p4, %p4231_p1 }
  0x3f   :  { %257 = vmatprep.mubr.bf16.mxu0 %v5037_v0  ;;  %370 = vmatprep.mubr.bf16.mxu1 %v5037_v0 }
  0x40   :  { %699 = vmatpush1.bf16.msra.mxu0 %v4354_v23  ;;  %741 = vmatprep.subr.bf16.mxu1 %v4374_v28 }
  0x41   :  { %700 = vmatprep.subr.bf16.mxu0 %v4358_v24  ;;  %742 = vmatpush1.bf16.msra.mxu1 %v4380_v30 }
  0x42   :  { %743 = vmatprep.subr.bf16.mxu1 %v4386_v33 }
  0x44   :  { %701 = vmatpush1.bf16.msra.mxu0 %v4371_v27 }
  0x45   :  { %702 = vmatprep.subr.bf16.mxu0 %v4378_v29  ;;  %744 = vmatpush1.bf16.msra.mxu1 %v4390_v34 }
  0x46   :  { %3357 = vmatmul.mubr.msk.bf16.gmra.mxu0 %vm170_vm0, %v3777_v31  ;;  %3365 = vmatmul.mubr.msk.bf16.gmra.mxu1 %vm170_vm0, %v3777_v31 }
  0x47   :  { %267 = vmatprep.mubr.bf16.mxu0 %v5037_v0  ;;  %380 = vmatprep.mubr.bf16.mxu1 %v5037_v0 }
  0x48   :  { %703 = vmatpush1.bf16.msra.mxu0 %v4383_v32  ;;  %745 = vmatprep.subr.bf16.mxu1 %v4398_v37 }
  0x49   :  { %704 = vmatprep.subr.bf16.mxu0 %v4392_v35  ;;  %746 = vmatpush1.bf16.msra.mxu1 %v4402_v38 }
  0x4a   :  { %747 = vmatprep.subr.bf16.mxu1 %v4409_v40 }
  0x4c   :  { %705 = vmatpush1.bf16.msra.mxu0 %v4396_v36 }
  0x4d   :  { %1043 = vmatprep.subr.bf16.mxu0 %v4307_v7  ;;  %748 = vmatpush1.bf16.msra.mxu1 %v4411_v41 }
  0x4e   :  { %3358 = vmatmul.mubr.msk.bf16.gmra.mxu0 %vm170_vm0, %v3784_v39  ;;  %3366 = vmatmul.mubr.msk.bf16.gmra.mxu1 %vm170_vm0, %v3784_v39 }
  0x4f   :  { %277 = vmatprep.mubr.bf16.mxu0 %v5037_v0  ;;  %390 = vmatprep.mubr.bf16.mxu1 %v5037_v0 }
  0x50   :  { %1086 = vmatprep.subr.bf16.mxu1 %v4324_v12 }
  0x56   :  { %3359 = vmatmul.mubr.msk.bf16.gmra.mxu0 %vm170_vm0, %v3791_v42  ;;  %3367 = vmatmul.mubr.msk.bf16.gmra.mxu1 %vm170_vm0, %v3791_v42 }
  0x57   :  { %287 = vmatprep.mubr.bf16.mxu0 %v5037_v0  ;;  %400 = vmatprep.mubr.bf16.mxu1 %v5037_v0 }
  0x5e   :  { %3360 = vmatmul.mubr.msk.bf16.gmra.mxu0 %vm170_vm0, %v3798_v43  ;;  %3368 = vmatmul.mubr.msk.bf16.gmra.mxu1 %vm170_vm0, %v3798_v43 }
  0x5f   :  { %297 = vmatprep.mubr.bf16.mxu0 %v5037_v0  ;;  %410 = vmatprep.mubr.bf16.mxu1 %v5037_v0 }
  0x66   :  { %3361 = vmatmul.mubr.msk.bf16.gmra.mxu0 %vm170_vm0, %v3808_v44  ;;  %3369 = vmatmul.mubr.msk.bf16.gmra.mxu1 %vm170_vm0, %v3808_v44 }
  0x67   :  { %722 = vmatprep.mubr.bf16.mxu0 %v5037_v0  ;;  %765 = vmatprep.mubr.bf16.mxu1 %v5037_v0 }
  0x6e   :  { %723 = vmatmul.mubr.bf16.vlgmr.msra.gmra.mxu0 %v4264_v45  ;;  %766 = vmatmul.mubr.bf16.vlgmr.msra.gmra.mxu1 %v4264_v45 }
  0x6f   :  { %1044 = vmatpush1.bf16.msra.mxu0 %v4305_v6  ;;  %1087 = vmatpush1.bf16.msra.mxu1 %v4322_v11 }
  0x70   :  { %1045 = vmatprep.subr.bf16.mxu0 %v4312_v8  ;;  %1088 = vmatprep.subr.bf16.mxu1 %v4336_v17 }
  0x71   :  { %1075 = vmatprep.mubr.bf16.mxu0 %v5037_v0  ;;  %1118 = vmatprep.mubr.bf16.mxu1 %v5037_v0 }
  0x73   :  { %1046 = vmatpush1.bf16.msra.mxu0 %v4316_v9  ;;  %1089 = vmatpush1.bf16.msra.mxu1 %v4334_v16 }
  0x74   :  { %1047 = vmatprep.subr.bf16.mxu0 %v4320_v10  ;;  %1090 = vmatprep.subr.bf16.mxu1 %v4352_v21 }
  0x77   :  { %1048 = vmatpush1.bf16.msra.mxu0 %v4327_v14  ;;  %1091 = vmatpush1.bf16.msra.mxu1 %v4348_v20 }
  0x78   :  { %1049 = vmatprep.subr.bf16.mxu0 %v4332_v15  ;;  %1092 = vmatprep.subr.bf16.mxu1 %v4360_v25 }
  0x7b   :  { %1050 = vmatpush1.bf16.msra.mxu0 %v4342_v18  ;;  %1093 = vmatpush1.bf16.msra.mxu1 %v4364_v26 }
  0x7c   :  { %1051 = vmatprep.subr.bf16.mxu0 %v4344_v19  ;;  %1094 = vmatprep.subr.bf16.mxu1 %v4374_v28 }
  0x7f   :  { %1052 = vmatpush1.bf16.msra.mxu0 %v4354_v23  ;;  %1095 = vmatpush1.bf16.msra.mxu1 %v4380_v30 }
  0x80   :  { %1053 = vmatprep.subr.bf16.mxu0 %v4358_v24  ;;  %1096 = vmatprep.subr.bf16.mxu1 %v4386_v33 }
  0x83   :  { %1054 = vmatpush1.bf16.msra.mxu0 %v4371_v27  ;;  %1097 = vmatpush1.bf16.msra.mxu1 %v4390_v34 }
  0x84   :  { %1055 = vmatprep.subr.bf16.mxu0 %v4378_v29  ;;  %1098 = vmatprep.subr.bf16.mxu1 %v4398_v37 }
  0x87   :  { %1056 = vmatpush1.bf16.msra.mxu0 %v4383_v32  ;;  %1099 = vmatpush1.bf16.msra.mxu1 %v4402_v38 }
  0x88   :  { %1057 = vmatprep.subr.bf16.mxu0 %v4392_v35  ;;  %1100 = vmatprep.subr.bf16.mxu1 %v4409_v40 }
  0x8b   :  { %1058 = vmatpush1.bf16.msra.mxu0 %v4396_v36  ;;  %1101 = vmatpush1.bf16.msra.mxu1 %v4411_v41 }
  0x8c   :  { %1397 = vmatprep.subr.bf16.mxu0 %v4307_v7  ;;  %1440 = vmatprep.subr.bf16.mxu1 %v4324_v12 }
  0xee   :  { %v4469_v48 = vpop.f32.mrf.mxu0  ;;  %v4471_v49 = vpop.f32.mrf.mxu1 }
  0xf0   :  { %v4473_v50 = vpop.f32.mrf.mxu0  ;;  %v4475_v51 = vpop.f32.mrf.mxu1 }
  0xf2   :  { %v4480_v55 = vpop.f32.mrf.mxu0  ;;  %v4482_v56 = vpop.f32.mrf.mxu1 }
  0xf4   :  { %v4484_v59 = vpop.f32.mrf.mxu0  ;;  %v4486_v60 = vpop.f32.mrf.mxu1 }
  0xf6   :  { %v239_v63 = vpop.f32.mrf.mxu0  ;;  %v352_v1 = vpop.f32.mrf.mxu1 }
  0xf7   :  { %v4497_v4 = vadd.f32 %v239_v63, %v4488_v61  ;;  %v4500_v5 = vadd.f32 %v352_v1, %v4490_v62 }
  0xf8   :  { %v241_v7 = vpop.f32.mrf.mxu0  ;;  %v354_v12 = vpop.f32.mrf.mxu1 }
  0xf9   :  { %v4503_v13 = vadd.f32 %v241_v7, %v4492_v2  ;;  %v4506_v22 = vadd.f32 %v354_v12, %v4494_v3 }
  0xfa   :  { %v243_v31 = vpop.f32.mrf.mxu0  ;;  %v356_v39 = vpop.f32.mrf.mxu1 }
  0xfb   :  { %v4509_v42 = vadd.f32 %v243_v31, %v4488_v61  ;;  %v4512_v43 = vadd.f32 %v356_v39, %v4490_v62 }
  0xfc   :  { %v245_v44 = vpop.f32.mrf.mxu0  ;;  %v358_v45 = vpop.f32.mrf.mxu1 }
  0xfd   :  { %v4515_v46 = vadd.f32 %v245_v44, %v4492_v2  ;;  %v4518_v47 = vadd.f32 %v358_v45, %v4494_v3 }
  0xfe   :  { %v249_v52 = vpop.f32.mrf.mxu0  ;;  %v362_v53 = vpop.f32.mrf.mxu1 }
  0xff   :  { %5039 = vst [vmem:[#allocation15_spill] sm:$0xff] %v4518_v47  ;;  %v4521_v54 = vadd.f32 %v249_v52, %v4488_v61  ;;  %v4524_v57 = vadd.f32 %v362_v53, %v4490_v62 }
 0x100   :  { %v251_v58 = vpop.f32.mrf.mxu0  ;;  %v364_v63 = vpop.f32.mrf.mxu1 }
 0x101   :  { %5040 = vst [vmem:[#allocation16_spill] sm:$0xff] %v4521_v54  ;;  %5041 = vst [vmem:[#allocation17_spill] sm:$0xff] %v4524_v57  ;;  %v4527_v1 = vadd.f32 %v251_v58, %v4492_v2  ;;  %v4530_v7 = vadd.f32 %v364_v63, %v4494_v3 }
 0x102   :  { %v253_v12 = vpop.f32.mrf.mxu0  ;;  %v366_v31 = vpop.f32.mrf.mxu1 }
 0x103   :  { %5042 = vst [vmem:[#allocation18_spill] sm:$0xff] %v4527_v1  ;;  %5043 = vst [vmem:[#allocation19_spill] sm:$0xff] %v4530_v7  ;;  %v4533_v39 = vadd.f32 %v253_v12, %v4488_v61  ;;  %v4536_v44 = vadd.f32 %v366_v31, %v4490_v62 }
 0x104   :  { %v255_v45 = vpop.f32.mrf.mxu0  ;;  %v368_v52 = vpop.f32.mrf.mxu1 }
 0x105   :  { %5044 = vst [vmem:[#allocation20_spill] sm:$0xff] %v4533_v39  ;;  %5045 = vst [vmem:[#allocation21_spill] sm:$0xff] %v4536_v44  ;;  %v4539_v53 = vadd.f32 %v255_v45, %v4492_v2  ;;  %v4542_v0 = vadd.f32 %v368_v52, %v4494_v3 }
 0x106   :  { %v259_v58 = vpop.f32.mrf.mxu0  ;;  %v372_v57 = vpop.f32.mrf.mxu1 }
 0x107   :  { %5046 = vst [vmem:[#allocation22_spill] sm:$0xff] %v4539_v53  ;;  %5047 = vst [vmem:[#allocation23_spill] sm:$0xff] %v4542_v0  ;;  %v4545_v63 = vadd.f32 %v259_v58, %v4488_v61  ;;  %v4548_v7 = vadd.f32 %v372_v57, %v4490_v62 }
 0x108   :  { %v261_v12 = vpop.f32.mrf.mxu0  ;;  %v374_v39 = vpop.f32.mrf.mxu1 }
 0x109   :  { %5048 = vst [vmem:[#allocation24_spill] sm:$0xff] %v4545_v63  ;;  %5049 = vst [vmem:[#allocation25_spill] sm:$0xff] %v4548_v7  ;;  %v4551_v31 = vadd.f32 %v261_v12, %v4492_v2  ;;  %v4554_v44 = vadd.f32 %v374_v39, %v4494_v3 }
 0x10a   :  { %v263_v45 = vpop.f32.mrf.mxu0  ;;  %v376_v53 = vpop.f32.mrf.mxu1 }
 0x10b   :  { %5050 = vst [vmem:[#allocation26_spill] sm:$0xff] %v4551_v31  ;;  %5051 = vst [vmem:[#allocation27_spill] sm:$0xff] %v4554_v44  ;;  %v4557_v52 = vadd.f32 %v263_v45, %v4488_v61  ;;  %v4560_v0 = vadd.f32 %v376_v53, %v4490_v62 }
 0x10c   :  { %v265_v58 = vpop.f32.mrf.mxu0  ;;  %v378_v63 = vpop.f32.mrf.mxu1 }
 0x10d   :  { %5052 = vst [vmem:[#allocation28_spill] sm:$0xff] %v4557_v52  ;;  %5053 = vst [vmem:[#allocation29_spill] sm:$0xff] %v4560_v0  ;;  %v4563_v57 = vadd.f32 %v265_v58, %v4492_v2  ;;  %v4566_v7 = vadd.f32 %v378_v63, %v4494_v3 }
 0x10e   :  { %v269_v12 = vpop.f32.mrf.mxu0  ;;  %v382_v31 = vpop.f32.mrf.mxu1 }
 0x10f   :  { %5054 = vst [vmem:[#allocation30_spill] sm:$0xff] %v4563_v57  ;;  %5055 = vst [vmem:[#allocation31_spill] sm:$0xff] %v4566_v7  ;;  %v4569_v39 = vadd.f32 %v269_v12, %v4488_v61  ;;  %v4572_v44 = vadd.f32 %v382_v31, %v4490_v62 }
 0x110   :  { %v271_v45 = vpop.f32.mrf.mxu0  ;;  %v384_v52 = vpop.f32.mrf.mxu1 }
 0x111   :  { %5056 = vst [vmem:[#allocation32_spill] sm:$0xff] %v4569_v39  ;;  %5057 = vst [vmem:[#allocation33_spill] sm:$0xff] %v4572_v44  ;;  %v4575_v53 = vadd.f32 %v271_v45, %v4492_v2  ;;  %v4578_v0 = vadd.f32 %v384_v52, %v4494_v3 }
 0x112   :  { %v273_v58 = vpop.f32.mrf.mxu0  ;;  %v386_v57 = vpop.f32.mrf.mxu1 }
 0x113   :  { %5058 = vst [vmem:[#allocation34_spill] sm:$0xff] %v4575_v53  ;;  %5059 = vst [vmem:[#allocation35_spill] sm:$0xff] %v4578_v0  ;;  %v4581_v63 = vadd.f32 %v273_v58, %v4488_v61  ;;  %v4584_v7 = vadd.f32 %v386_v57, %v4490_v62 }
 0x114   :  { %v275_v12 = vpop.f32.mrf.mxu0  ;;  %v388_v39 = vpop.f32.mrf.mxu1 }
 0x115   :  { %5060 = vst [vmem:[#allocation36_spill] sm:$0xff] %v4581_v63  ;;  %5061 = vst [vmem:[#allocation37_spill] sm:$0xff] %v4584_v7  ;;  %v4587_v31 = vadd.f32 %v275_v12, %v4492_v2  ;;  %v4590_v44 = vadd.f32 %v388_v39, %v4494_v3 }
 0x116   :  { %v279_v45 = vpop.f32.mrf.mxu0  ;;  %v392_v53 = vpop.f32.mrf.mxu1 }
 0x117   :  { %5062 = vst [vmem:[#allocation38_spill] sm:$0xff] %v4587_v31  ;;  %5063 = vst [vmem:[#allocation39_spill] sm:$0xff] %v4590_v44  ;;  %v4593_v52 = vadd.f32 %v279_v45, %v4488_v61  ;;  %v4596_v0 = vadd.f32 %v392_v53, %v4490_v62 }
 0x118   :  { %v281_v58 = vpop.f32.mrf.mxu0  ;;  %v394_v63 = vpop.f32.mrf.mxu1 }
 0x119   :  { %5064 = vst [vmem:[#allocation40_spill] sm:$0xff] %v4593_v52  ;;  %5065 = vst [vmem:[#allocation41_spill] sm:$0xff] %v4596_v0  ;;  %v4599_v57 = vadd.f32 %v281_v58, %v4492_v2  ;;  %v4602_v7 = vadd.f32 %v394_v63, %v4494_v3 }
 0x11a   :  { %v283_v12 = vpop.f32.mrf.mxu0  ;;  %v396_v31 = vpop.f32.mrf.mxu1 }
 0x11b   :  { %5066 = vst [vmem:[#allocation42_spill] sm:$0xff] %v4599_v57  ;;  %5067 = vst [vmem:[#allocation43_spill] sm:$0xff] %v4602_v7  ;;  %v4605_v39 = vadd.f32 %v283_v12, %v4488_v61  ;;  %v4608_v44 = vadd.f32 %v396_v31, %v4490_v62 }
 0x11c   :  { %v285_v45 = vpop.f32.mrf.mxu0  ;;  %v398_v52 = vpop.f32.mrf.mxu1 }
 0x11d   :  { %5068 = vst [vmem:[#allocation44_spill] sm:$0xff] %v4605_v39  ;;  %5069 = vst [vmem:[#allocation45_spill] sm:$0xff] %v4608_v44  ;;  %v4611_v53 = vadd.f32 %v285_v45, %v4492_v2  ;;  %v4614_v0 = vadd.f32 %v398_v52, %v4494_v3 }
 0x11e   :  { %v289_v58 = vpop.f32.mrf.mxu0  ;;  %v402_v57 = vpop.f32.mrf.mxu1 }
 0x11f   :  { %5070 = vst [vmem:[#allocation46_spill] sm:$0xff] %v4611_v53  ;;  %5071 = vst [vmem:[#allocation47_spill] sm:$0xff] %v4614_v0  ;;  %v4617_v63 = vadd.f32 %v289_v58, %v4488_v61  ;;  %v4620_v7 = vadd.f32 %v402_v57, %v4490_v62 }
 0x120   :  { %v291_v12 = vpop.f32.mrf.mxu0  ;;  %v404_v39 = vpop.f32.mrf.mxu1 }
 0x121   :  { %5072 = vst [vmem:[#allocation48_spill] sm:$0xff] %v4617_v63  ;;  %5073 = vst [vmem:[#allocation49_spill] sm:$0xff] %v4620_v7  ;;  %v4623_v31 = vadd.f32 %v291_v12, %v4492_v2  ;;  %v4626_v44 = vadd.f32 %v404_v39, %v4494_v3 }
 0x122   :  { %v293_v45 = vpop.f32.mrf.mxu0  ;;  %v406_v53 = vpop.f32.mrf.mxu1 }
 0x123   :  { %5074 = vst [vmem:[#allocation50_spill] sm:$0xff] %v4623_v31  ;;  %5075 = vst [vmem:[#allocation51_spill] sm:$0xff] %v4626_v44  ;;  %v4629_v52 = vadd.f32 %v293_v45, %v4488_v61  ;;  %v4632_v0 = vadd.f32 %v406_v53, %v4490_v62 }
 0x124   :  { %v295_v58 = vpop.f32.mrf.mxu0  ;;  %v408_v63 = vpop.f32.mrf.mxu1 }
 0x125   :  { %5076 = vst [vmem:[#allocation52_spill] sm:$0xff] %v4629_v52  ;;  %5077 = vst [vmem:[#allocation53_spill] sm:$0xff] %v4632_v0  ;;  %v4635_v57 = vadd.f32 %v295_v58, %v4492_v2  ;;  %v4638_v7 = vadd.f32 %v408_v63, %v4494_v3 }
 0x126   :  { %v299_v12 = vpop.f32.mrf.mxu0  ;;  %v412_v31 = vpop.f32.mrf.mxu1 }
 0x127   :  { %5078 = vst [vmem:[#allocation54_spill] sm:$0xff] %v4635_v57  ;;  %5079 = vst [vmem:[#allocation55_spill] sm:$0xff] %v4638_v7  ;;  %v4641_v39 = vadd.f32 %v299_v12, %v4488_v61  ;;  %v4644_v44 = vadd.f32 %v412_v31, %v4490_v62  ;;  %v230_v31 = vadd.f32 %v4469_v48, %v4488_v61 }
 0x128   :  { %v301_v45 = vpop.f32.mrf.mxu0  ;;  %v414_v52 = vpop.f32.mrf.mxu1  ;;  %v236_v48 = vadd.f32 %v4484_v59, %v4492_v2  ;;  %v347_v59 = vadd.f32 %v4482_v56, %v4490_v62 }
 0x129   :  { %5080 = vst [vmem:[#allocation56_spill] sm:$0xff] %v4641_v39  ;;  %5081 = vst [vmem:[#allocation57_spill] sm:$0xff] %v4644_v44  ;;  %v4647_v53 = vadd.f32 %v301_v45, %v4492_v2  ;;  %v4650_v0 = vadd.f32 %v414_v52, %v4494_v3 }
 0x12a   :  { %v303_v58 = vpop.f32.mrf.mxu0  ;;  %v416_v57 = vpop.f32.mrf.mxu1 }
 0x12b   :  { %5082 = vst [vmem:[#allocation58_spill] sm:$0xff] %v4647_v53  ;;  %5083 = vst [vmem:[#allocation59_spill] sm:$0xff] %v4650_v0  ;;  %v4653_v63 = vadd.f32 %v303_v58, %v4488_v61  ;;  %v4656_v7 = vadd.f32 %v416_v57, %v4490_v62  ;;  %v232_v0 = vadd.f32 %v4473_v50, %v4492_v2 }
 0x12c   :  { %v305_v12 = vpop.f32.mrf.mxu0  ;;  %v418_v39 = vpop.f32.mrf.mxu1  ;;  %v234_v57 = vadd.f32 %v4480_v55, %v4488_v61  ;;  %v343_v55 = vadd.f32 %v4471_v49, %v4490_v62  ;;  %v345_v61 = vadd.f32 %v4475_v51, %v4494_v3 }
 0x12d   :  { %5084 = vst [vmem:[#allocation60_spill] sm:$0xff] %v4653_v63  ;;  %5085 = vst [vmem:[#allocation61_spill] sm:$0xff] %v4656_v7  ;;  %v4661_v44 = vadd.f32 %v305_v12, %v4492_v2  ;;  %v4664_v45 = vadd.f32 %v418_v39, %v4494_v3 }
 0x12e   :  { %v724_v52 = vpop.f32.mrf.mxu0  ;;  %v767_v12 = vpop.f32.mrf.mxu1 }
 0x12f   :  { %5086 = vst [vmem:[#allocation62_spill] sm:$0xff] %v4661_v44  ;;  %5087 = vst [vmem:[#allocation63_spill] sm:$0xff] %v4664_v45  ;;  %v776_v58 = vadd.f32 %v724_v52, %v230_v31  ;;  %v778_v2 = vadd.f32 %v767_v12, %v343_v55 }
 0x130   :  { %v726_v63 = vpop.f32.mrf.mxu0  ;;  %v769_v50 = vpop.f32.mrf.mxu1 }
 0x131   :  { %v3402_v7 = vmul.f32 -1.442695, %v776_v58  ;;  %v777_v53 = vadd.f32 %v726_v63, %v232_v0 }
 0x132   :  { %v728_v1 = vpop.f32.mrf.mxu0  ;;  %v771_v0 = vpop.f32.mrf.mxu1 }
 0x133   :  { %3914 = vpow2.f32 %v3402_v7  ;;  %v3403_v44 = vmul.f32 -1.442695, %v777_v53  ;;  %v780_v39 = vadd.f32 %v728_v1, %v234_v57  ;;  %v779_v1 = vadd.f32 %v769_v50, %v345_v61 }
 0x134   :  { %v730_v45 = vpop.f32.mrf.mxu0  ;;  %v782_v7 = vadd.f32 %v771_v0, %v347_v59  ;;  %v3404_v53 = vmul.f32 -1.442695, %v778_v2 }
 0x135   :  { %3916 = vpow2.f32 %v3403_v44  ;;  %v3405_v54 = vmul.f32 -1.442695, %v780_v39  ;;  %v781_v47 = vadd.f32 %v730_v45, %v236_v48  ;;  %v773_v45 = vpop.f32.mrf.mxu1 }
 0x136   :  { %v3407_v49 = vmul.f32 -1.442695, %v782_v7 }
 0x137   :  { %3918 = vpow2.f32 %v3405_v54  ;;  %v3406_v31 = vmul.f32 -1.442695, %v781_v47  ;;  %v349_v47 = vadd.f32 %v4486_v60, %v4494_v3 }
 0x139   :  { %3920 = vpow2.f32 %v3406_v31  ;;  %v783_v51 = vadd.f32 %v773_v45, %v349_v47 }
 0x13a   :  { %3922 = vtanh.f32 %v779_v1 }
 0x140   :  { %v3915_v44 = vpop.eup %3914 }
 0x141   :  { %v802_v63 = vadd.f32 1.0, %v3915_v44 }
 0x142   :  { %v3917_v54 = vpop.eup %3916 }
 0x143   :  { %3924 = vrcp.f32 %v802_v63  ;;  %v803_v52 = vadd.f32 1.0, %v3917_v54 }
 0x144   :  { %v3919_v58 = vpop.eup %3918  ;;  %3926 = vpow2.f32 %v3404_v53 }
 0x145   :  { %3928 = vrcp.f32 %v803_v52  ;;  %v805_v56 = vadd.f32 1.0, %v3919_v58 }
 0x146   :  { %v3921_v62 = vpop.eup %3920  ;;  %3930 = vpow2.f32 %v3407_v49 }
 0x147   :  { %3932 = vrcp.f32 %v805_v56  ;;  %v806_v57 = vadd.f32 1.0, %v3921_v62  ;;  %v3923_v48 = vpop.eup %3922 }
 0x148   :  { %3934 = vtanh.f32 %v783_v51  ;;  %v5088_v51 = vmov 0  }
 0x149   :  { %3936 = vrcp.f32 %v806_v57 }
 0x150   :  { %v3925_v12 = vpop.eup %3924 }
 0x151   :  { %v3927_v39 = vpop.eup %3926  ;;  %v824_v50 = vmul.f32 %v3925_v12, %v3923_v48 }
 0x152   :  { %v3929_v60 = vpop.eup %3928  ;;  %v804_v0 = vadd.f32 1.0, %v3927_v39 }
 0x153   :  { %v3931_v3 = vpop.eup %3930  ;;  %v822_v31 = vmul.f32 0.0, %v3929_v60 }
 0x154   :  { %v3933_v55 = vpop.eup %3932  ;;  %v807_v1 = vadd.f32 1.0, %v3931_v3  ;;  %3938 = vrcp.f32 %v804_v0 }
 0x155   :  { %v3935_v61 = vpop.eup %3934  ;;  %v4680_v59 = vadd.f32 %v824_v50, %v822_v31 }
 0x156   :  { %v3937_v2 = vpop.eup %3936  ;;  %v825_v44 = vmul.f32 %v3935_v61, %v3933_v55 }
 0x157   :  { %v823_v7 = vmul.f32 0.0, %v3937_v2  ;;  %3940 = vtanh.f32 %v4680_v59 }
 0x158   :  { %3942 = vrcp.f32 %v807_v1 }
 0x159   :  { %v4683_v53 = vadd.f32 %v825_v44, %v823_v7  ;;  %v4736_v44 = vld [vmem:[#allocation10 + $0xe4] ss:$16 sps:$4 sm:$0xff]  }
 0x15b   :  { %3944 = vtanh.f32 %v4683_v53 }
 0x161   :  { %v3939_v63 = vpop.eup %3938 }
 0x164   :  { %v3941_v45 = vpop.eup %3940 }
 0x165   :  { %v3943_v54 = vpop.eup %3942  ;;  %v830_v49 = vmul.f32 %v3941_v45, %v3939_v63  ;;  %v4740_v63 = vld [vmem:[#allocation10 + $0xe0] ss:$16 sps:$4 sm:$0xff]   ;;  %v4742_v45 = vld [vmem:[#allocation10 + $0xe8] ss:$16 sps:$4 sm:$0xff]  }
 0x168   :  { %v3945_v47 = vpop.eup %3944 }
 0x169   :  { %v831_v52 = vmul.f32 %v3945_v47, %v3943_v54  ;;  %v4748_v54 = vld [vmem:[#allocation10 + $0xc4] ss:$16 sps:$4 sm:$0xff]   ;;  %v4750_v47 = vld [vmem:[#allocation10 + $0xcc] ss:$16 sps:$4 sm:$0xff]  }
 0x16b   :  { %v832_v58 = vpack.c.bf16 %v831_v52, %v830_v49  ;;  %v4752_v49 = vld [vmem:[#allocation10 + $0xc0] ss:$16 sps:$4 sm:$0xff]   ;;  %v4754_v52 = vld [vmem:[#allocation10 + $0xc8] ss:$16 sps:$4 sm:$0xff]  }
 0x16d   :  { %3710 = vst [vmem:[#allocation11] sm:$0xff] %v832_v58   ;;  %1076 = vmatmul.mubr.bf16.vlgmr.msra.gmra.mxu0 %v832_v58  ;;  %1119 = vmatmul.mubr.bf16.vlgmr.msra.gmra.mxu1 %v832_v58  ;;  %v4760_v58 = vld [vmem:[#allocation10 + $0xa4] ss:$16 sps:$4 sm:$0xff]  }
 0x16e   :  { %1398 = vmatpush1.bf16.msra.mxu0 %v4305_v6  ;;  %1441 = vmatpush1.bf16.msra.mxu1 %v4322_v11 }
 0x16f   :  { %1399 = vmatprep.subr.bf16.mxu0 %v4312_v8  ;;  %1442 = vmatprep.subr.bf16.mxu1 %v4336_v17 }
 0x170   :  { %1429 = vmatprep.mubr.bf16.mxu0 %v5088_v51  ;;  %1472 = vmatprep.mubr.bf16.mxu1 %v5088_v51 }
 0x172   :  { %1400 = vmatpush1.bf16.msra.mxu0 %v4316_v9  ;;  %1443 = vmatpush1.bf16.msra.mxu1 %v4334_v16 }
 0x173   :  { %1401 = vmatprep.subr.bf16.mxu0 %v4320_v10  ;;  %1444 = vmatprep.subr.bf16.mxu1 %v4352_v21 }
 0x176   :  { %1402 = vmatpush1.bf16.msra.mxu0 %v4327_v14  ;;  %1445 = vmatpush1.bf16.msra.mxu1 %v4348_v20 }
 0x177   :  { %1403 = vmatprep.subr.bf16.mxu0 %v4332_v15  ;;  %1446 = vmatprep.subr.bf16.mxu1 %v4360_v25 }
 0x17a   :  { %1404 = vmatpush1.bf16.msra.mxu0 %v4342_v18  ;;  %1447 = vmatpush1.bf16.msra.mxu1 %v4364_v26 }
 0x17b   :  { %1405 = vmatprep.subr.bf16.mxu0 %v4344_v19  ;;  %1448 = vmatprep.subr.bf16.mxu1 %v4374_v28 }
 0x17e   :  { %1406 = vmatpush1.bf16.msra.mxu0 %v4354_v23  ;;  %1449 = vmatpush1.bf16.msra.mxu1 %v4380_v30 }
 0x17f   :  { %1407 = vmatprep.subr.bf16.mxu0 %v4358_v24  ;;  %1450 = vmatprep.subr.bf16.mxu1 %v4386_v33 }
 0x182   :  { %1408 = vmatpush1.bf16.msra.mxu0 %v4371_v27  ;;  %1451 = vmatpush1.bf16.msra.mxu1 %v4390_v34 }
 0x183   :  { %1409 = vmatprep.subr.bf16.mxu0 %v4378_v29  ;;  %1452 = vmatprep.subr.bf16.mxu1 %v4398_v37 }
 0x186   :  { %1410 = vmatpush1.bf16.msra.mxu0 %v4383_v32  ;;  %1453 = vmatpush1.bf16.msra.mxu1 %v4402_v38 }
 0x187   :  { %1411 = vmatprep.subr.bf16.mxu0 %v4392_v35  ;;  %1454 = vmatprep.subr.bf16.mxu1 %v4409_v40  ;;  %v5089_v35 = vld [vmem:[#allocation15_spill] sm:$0xff] }
 0x18a   :  { %1412 = vmatpush1.bf16.msra.mxu0 %v4396_v36  ;;  %1455 = vmatpush1.bf16.msra.mxu1 %v4411_v41 }
 0x18b   :  { %1751 = vmatprep.subr.bf16.mxu0 %v4736_v44 }
 0x22d   :  { %v1077_v6 = vpop.f32.mrf.mxu0  ;;  %v1120_v11 = vpop.f32.mrf.mxu1 }
 0x22e   :  { %v1129_v8 = vadd.f32 %v1077_v6, %v4497_v4  ;;  %v1131_v24 = vadd.f32 %v1120_v11, %v4500_v5  ;;  %v4762_v6 = vld [vmem:[#allocation10 + $0xac] ss:$16 sps:$4 sm:$0xff]  }
 0x22f   :  { %v1079_v9 = vpop.f32.mrf.mxu0  ;;  %v1122_v19 = vpop.f32.mrf.mxu1  ;;  %v4774_v11 = vld [vmem:[#allocation10 + $0x8c] ss:$16 sps:$4 sm:$0xff]  }
 0x230   :  { %v3442_v10 = vmul.f32 -1.442695, %v1129_v8  ;;  %v1130_v14 = vadd.f32 %v1079_v9, %v4503_v13  ;;  %v3444_v27 = vmul.f32 -1.442695, %v1131_v24  ;;  %v1132_v28 = vadd.f32 %v1122_v19, %v4506_v22  ;;  %v4764_v8 = vld [vmem:[#allocation10 + $0xa0] ss:$16 sps:$4 sm:$0xff]  }
 0x231   :  { %v1081_v15 = vpop.f32.mrf.mxu0  ;;  %v1124_v25 = vpop.f32.mrf.mxu1  ;;  %v4766_v9 = vld [vmem:[#allocation10 + $0xa8] ss:$16 sps:$4 sm:$0xff]  }
 0x232   :  { %3946 = vpow2.f32 %v3442_v10  ;;  %v3443_v16 = vmul.f32 -1.442695, %v1130_v14  ;;  %v1133_v17 = vadd.f32 %v1081_v15, %v4509_v42  ;;  %v1135_v26 = vadd.f32 %v1124_v25, %v4512_v43  ;;  %v4772_v10 = vld [vmem:[#allocation10 + $0x84] ss:$16 sps:$4 sm:$0xff]   ;;  %v4776_v14 = vld [vmem:[#allocation10 + $0x80] ss:$16 sps:$4 sm:$0xff]  }
 0x233   :  { %v1083_v18 = vpop.f32.mrf.mxu0  ;;  %v1126_v29 = vpop.f32.mrf.mxu1  ;;  %v4778_v15 = vld [vmem:[#allocation10 + $0x88] ss:$16 sps:$4 sm:$0xff]   ;;  %v4806_v25 = vld [vmem:[#allocation10 + $0x24] ss:$16 sps:$4 sm:$0xff]  }
 0x234   :  { %3948 = vpow2.f32 %v3443_v16  ;;  %v3445_v20 = vmul.f32 -1.442695, %v1133_v17  ;;  %v1134_v21 = vadd.f32 %v1083_v18, %v4515_v46  ;;  %v3447_v32 = vmul.f32 -1.442695, %v1135_v26  ;;  %v4782_v16 = vld [vmem:[#allocation10 + $0x64] ss:$16 sps:$4 sm:$0xff]  }
 0x235   :  { %v1136_v36 = vadd.f32 %v1126_v29, %v5089_v35  ;;  %v4784_v17 = vld [vmem:[#allocation10 + $0x6c] ss:$16 sps:$4 sm:$0xff]   ;;  %v4788_v18 = vld [vmem:[#allocation10 + $0x60] ss:$16 sps:$4 sm:$0xff]   ;;  %v4790_v19 = vld [vmem:[#allocation10 + $0x68] ss:$16 sps:$4 sm:$0xff]  }
 0x236   :  { %3950 = vpow2.f32 %v3445_v20  ;;  %v3446_v23 = vmul.f32 -1.442695, %v1134_v21  ;;  %v4794_v20 = vld [vmem:[#allocation10 + $0x44] ss:$16 sps:$4 sm:$0xff]   ;;  %v4796_v21 = vld [vmem:[#allocation10 + $0x4c] ss:$16 sps:$4 sm:$0xff]  }
 0x237   :  { %v4802_v24 = vld [vmem:[#allocation10 + $0x48] ss:$16 sps:$4 sm:$0xff]   ;;  %v4808_v26 = vld [vmem:[#allocation10 + $0x2c] ss:$16 sps:$4 sm:$0xff]   ;;  %v4818_v29 = vld [vmem:[#allocation10 + $0x4] ss:$16 sps:$4 sm:$0xff]  }
 0x238   :  { %3952 = vpow2.f32 %v3446_v23  ;;  %v4800_v23 = vld [vmem:[#allocation10 + $0x40] ss:$16 sps:$4 sm:$0xff]   ;;  %v5090_v35 = vld [vmem:[#allocation16_spill] sm:$0xff] }
 0x239   :  { %3954 = vpow2.f32 %v3444_v27  ;;  %v4812_v27 = vld [vmem:[#allocation10 + $0x20] ss:$16 sps:$4 sm:$0xff]  }
 0x23a   :  { %3956 = vtanh.f32 %v1132_v28  ;;  %v4814_v28 = vld [vmem:[#allocation10 + $0x28] ss:$16 sps:$4 sm:$0xff]  }
 0x23f   :  { %v3947_v30 = vpop.eup %3946 }
 0x240   :  { %v1155_v33 = vadd.f32 1.0, %v3947_v30  ;;  %v4820_v30 = vld [vmem:[#allocation10 + $0xc] ss:$16 sps:$4 sm:$0xff]  }
 0x241   :  { %v3949_v34 = vpop.eup %3948 }
 0x242   :  { %3958 = vrcp.f32 %v1155_v33  ;;  %v1156_v37 = vadd.f32 1.0, %v3949_v34  ;;  %v4826_v33 = vld [vmem:[#allocation10 + $0x8] ss:$16 sps:$4 sm:$0xff]  }
 0x243   :  { %v3951_v38 = vpop.eup %3950  ;;  %3960 = vpow2.f32 %v3447_v32  ;;  %v4824_v32 = vld [vmem:[#allocation10] ss:$16 sps:$4 sm:$0xff]  }
 0x244   :  { %3962 = vrcp.f32 %v1156_v37  ;;  %v1158_v40 = vadd.f32 1.0, %v3951_v38 }
 0x245   :  { %v3953_v41 = vpop.eup %3952  ;;  %3964 = vtanh.f32 %v1136_v36 }
 0x246   :  { %3966 = vrcp.f32 %v1158_v40  ;;  %v1159_v4 = vadd.f32 1.0, %v3953_v41  ;;  %v3955_v5 = vpop.eup %3954  ;;  %v5091_v41 = vld [vmem:[#allocation18_spill] sm:$0xff] }
 0x247   :  { %v3957_v13 = vpop.eup %3956  ;;  %v1157_v48 = vadd.f32 1.0, %v3955_v5 }
 0x248   :  { %3968 = vrcp.f32 %v1159_v4 }
 0x249   :  { %3970 = vrcp.f32 %v1157_v48 }
 0x24f   :  { %v3959_v22 = vpop.eup %3958 }
 0x250   :  { %v3961_v42 = vpop.eup %3960  ;;  %v1177_v43 = vmul.f32 %v3959_v22, %v3957_v13  ;;  %v5092_v22 = vld [vmem:[#allocation20_spill] sm:$0xff] }
 0x251   :  { %v3963_v46 = vpop.eup %3962  ;;  %v1160_v60 = vadd.f32 1.0, %v3961_v42 }
 0x252   :  { %v3965_v56 = vpop.eup %3964  ;;  %v1175_v62 = vmul.f32 %v3963_v46, %v4680_v59 }
 0x253   :  { %v3967_v57 = vpop.eup %3966 }
 0x254   :  { %v4727_v12 = vadd.f32 %v1177_v43, %v1175_v62  ;;  %v1178_v39 = vmul.f32 %v3967_v57, %v3965_v56  ;;  %v5093_v62 = vld [vmem:[#allocation22_spill] sm:$0xff] }
 0x255   :  { %v3969_v50 = vpop.eup %3968 }
 0x256   :  { %v1176_v3 = vmul.f32 %v3969_v50, %v4683_v53  ;;  %3972 = vtanh.f32 %v4727_v12  ;;  %v3971_v55 = vpop.eup %3970  ;;  %v4738_v53 = vld [vmem:[#allocation10 + $0xec] ss:$16 sps:$4 sm:$0xff]  }
 0x257   :  { %3974 = vrcp.f32 %v1160_v60  ;;  %1794 = vmatprep.subr.bf16.mxu1 %v4738_v53 }
 0x258   :  { %v4731_v31 = vadd.f32 %v1178_v39, %v1176_v3  ;;  %v5094_v39 = vld [vmem:[#allocation17_spill] sm:$0xff] }
 0x259   :  { %v5095_v3 = vld [vmem:[#allocation21_spill] sm:$0xff] }
 0x25a   :  { %3976 = vtanh.f32 %v4731_v31 }
 0x263   :  { %v3973_v0 = vpop.eup %3972 }
 0x264   :  { %v3975_v61 = vpop.eup %3974  ;;  %v1183_v2 = vmul.f32 %v3973_v0, %v3971_v55 }
 0x267   :  { %v3977_v59 = vpop.eup %3976 }
 0x268   :  { %v1184_v1 = vmul.f32 %v3977_v59, %v3975_v61  ;;  %v5096_v61 = vld [vmem:[#allocation19_spill] sm:$0xff] }
 0x26a   :  { %v1185_v7 = vpack.c.bf16 %v1184_v1, %v1183_v2 }
 0x26c   :  { %3715 = vst [vmem:[#allocation11 + $0x8] sm:$0xff] %v1185_v7   ;;  %1430 = vmatmul.mubr.bf16.vlgmr.msra.gmra.mxu0 %v1185_v7  ;;  %1473 = vmatmul.mubr.bf16.vlgmr.msra.gmra.mxu1 %v1185_v7 }
 0x26d   :  { %1783 = vmatprep.mubr.bf16.mxu0 %v5088_v51  ;;  %1826 = vmatprep.mubr.bf16.mxu1 %v5088_v51 }
 0x26e   :  { %1752 = vmatpush1.bf16.msra.mxu0 %v4740_v63  ;;  %1795 = vmatpush1.bf16.msra.mxu1 %v4742_v45 }
 0x26f   :  { %1753 = vmatprep.subr.bf16.mxu0 %v4748_v54  ;;  %1796 = vmatprep.subr.bf16.mxu1 %v4750_v47 }
 0x272   :  { %1754 = vmatpush1.bf16.msra.mxu0 %v4752_v49  ;;  %1797 = vmatpush1.bf16.msra.mxu1 %v4754_v52 }
 0x273   :  { %1755 = vmatprep.subr.bf16.mxu0 %v4760_v58  ;;  %1798 = vmatprep.subr.bf16.mxu1 %v4762_v6 }
 0x276   :  { %1756 = vmatpush1.bf16.msra.mxu0 %v4764_v8  ;;  %1799 = vmatpush1.bf16.msra.mxu1 %v4766_v9 }
 0x277   :  { %1757 = vmatprep.subr.bf16.mxu0 %v4772_v10  ;;  %1800 = vmatprep.subr.bf16.mxu1 %v4774_v11 }
 0x27a   :  { %1758 = vmatpush1.bf16.msra.mxu0 %v4776_v14  ;;  %1801 = vmatpush1.bf16.msra.mxu1 %v4778_v15 }
 0x27b   :  { %1759 = vmatprep.subr.bf16.mxu0 %v4782_v16  ;;  %1802 = vmatprep.subr.bf16.mxu1 %v4784_v17 }
 0x27e   :  { %1760 = vmatpush1.bf16.msra.mxu0 %v4788_v18  ;;  %1803 = vmatpush1.bf16.msra.mxu1 %v4790_v19 }
 0x27f   :  { %1761 = vmatprep.subr.bf16.mxu0 %v4794_v20  ;;  %1804 = vmatprep.subr.bf16.mxu1 %v4796_v21 }
 0x282   :  { %1762 = vmatpush1.bf16.msra.mxu0 %v4800_v23  ;;  %1805 = vmatpush1.bf16.msra.mxu1 %v4802_v24 }
 0x283   :  { %1763 = vmatprep.subr.bf16.mxu0 %v4806_v25  ;;  %1806 = vmatprep.subr.bf16.mxu1 %v4808_v26 }
 0x286   :  { %1764 = vmatpush1.bf16.msra.mxu0 %v4812_v27  ;;  %1807 = vmatpush1.bf16.msra.mxu1 %v4814_v28 }
 0x287   :  { %1765 = vmatprep.subr.bf16.mxu0 %v4818_v29  ;;  %1808 = vmatprep.subr.bf16.mxu1 %v4820_v30 }
 0x28a   :  { %1766 = vmatpush1.bf16.msra.mxu0 %v4824_v32  ;;  %1809 = vmatpush1.bf16.msra.mxu1 %v4826_v33 }
 0x28b   :  { %2105 = vmatprep.subr.bf16.mxu0 %v4736_v44  ;;  %2148 = vmatprep.subr.bf16.mxu1 %v4738_v53 }
 0x32c   :  { %v1431_v34 = vpop.f32.mrf.mxu0  ;;  %v1474_v40 = vpop.f32.mrf.mxu1 }
 0x32d   :  { %v1483_v36 = vadd.f32 %v1431_v34, %v5090_v35  ;;  %v1485_v50 = vadd.f32 %v1474_v40, %v5094_v39 }
 0x32e   :  { %v1433_v37 = vpop.f32.mrf.mxu0  ;;  %v1476_v46 = vpop.f32.mrf.mxu1 }
 0x32f   :  { %v3482_v38 = vmul.f32 -1.442695, %v1483_v36  ;;  %v1484_v4 = vadd.f32 %v1433_v37, %v5091_v41  ;;  %v3484_v0 = vmul.f32 -1.442695, %v1485_v50  ;;  %v1486_v59 = vadd.f32 %v1476_v46, %v5096_v61  ;;  %v5097_v36 = vld [vmem:[#allocation23_spill] sm:$0xff] }
 0x330   :  { %v1435_v5 = vpop.f32.mrf.mxu0  ;;  %v1478_v60 = vpop.f32.mrf.mxu1 }
 0x331   :  { %3978 = vpow2.f32 %v3482_v38  ;;  %v3483_v13 = vmul.f32 -1.442695, %v1484_v4  ;;  %v1487_v42 = vadd.f32 %v1435_v5, %v5092_v22  ;;  %v1489_v55 = vadd.f32 %v1478_v60, %v5095_v3 }
 0x332   :  { %v1437_v43 = vpop.f32.mrf.mxu0  ;;  %v1480_v2 = vpop.f32.mrf.mxu1 }
 0x333   :  { %3980 = vpow2.f32 %v3483_v13  ;;  %v3485_v56 = vmul.f32 -1.442695, %v1487_v42  ;;  %v1488_v57 = vadd.f32 %v1437_v43, %v5093_v62  ;;  %v3487_v7 = vmul.f32 -1.442695, %v1489_v55 }
 0x334   :  { %v1490_v37 = vadd.f32 %v1480_v2, %v5097_v36  ;;  %v5098_v36 = vld [vmem:[#allocation24_spill] sm:$0xff] }
 0x335   :  { %3982 = vpow2.f32 %v3485_v56  ;;  %v3486_v48 = vmul.f32 -1.442695, %v1488_v57 }
 0x337   :  { %3984 = vpow2.f32 %v3486_v48 }
 0x338   :  { %3986 = vpow2.f32 %v3484_v0 }
 0x339   :  { %3988 = vtanh.f32 %v1486_v59 }
 0x33e   :  { %v3979_v1 = vpop.eup %3978 }
 0x33f   :  { %v1509_v34 = vadd.f32 1.0, %v3979_v1 }
 0x340   :  { %v3981_v35 = vpop.eup %3980 }
 0x341   :  { %3990 = vrcp.f32 %v1509_v34  ;;  %v1510_v38 = vadd.f32 1.0, %v3981_v35 }
 0x342   :  { %v3983_v41 = vpop.eup %3982  ;;  %3992 = vpow2.f32 %v3487_v7 }
 0x343   :  { %3994 = vrcp.f32 %v1510_v38  ;;  %v1512_v40 = vadd.f32 1.0, %v3983_v41 }
 0x344   :  { %v3985_v4 = vpop.eup %3984  ;;  %3996 = vtanh.f32 %v1490_v37 }
 0x345   :  { %3998 = vrcp.f32 %v1512_v40  ;;  %v1513_v5 = vadd.f32 1.0, %v3985_v4  ;;  %v3987_v13 = vpop.eup %3986  ;;  %v5099_v4 = vld [vmem:[#allocation26_spill] sm:$0xff] }
 0x346   :  { %v3989_v22 = vpop.eup %3988  ;;  %v1511_v39 = vadd.f32 1.0, %v3987_v13 }
 0x347   :  { %4000 = vrcp.f32 %v1513_v5 }
 0x348   :  { %4002 = vrcp.f32 %v1511_v39 }
 0x34e   :  { %v3991_v42 = vpop.eup %3990 }
 0x34f   :  { %v3993_v43 = vpop.eup %3992  ;;  %v1531_v46 = vmul.f32 %v3991_v42, %v3989_v22  ;;  %v5100_v42 = vld [vmem:[#allocation28_spill] sm:$0xff] }
 0x350   :  { %v3995_v56 = vpop.eup %3994  ;;  %v1514_v55 = vadd.f32 1.0, %v3993_v43 }
 0x351   :  { %v3997_v62 = vpop.eup %3996  ;;  %v1529_v57 = vmul.f32 %v3995_v56, %v4727_v12 }
 0x352   :  { %v3999_v48 = vpop.eup %3998 }
 0x353   :  { %v4843_v50 = vadd.f32 %v1531_v46, %v1529_v57  ;;  %v1532_v60 = vmul.f32 %v3999_v48, %v3997_v62  ;;  %v5101_v57 = vld [vmem:[#allocation30_spill] sm:$0xff] }
 0x354   :  { %v4001_v3 = vpop.eup %4000 }
 0x355   :  { %v1530_v0 = vmul.f32 %v4001_v3, %v4731_v31  ;;  %4004 = vtanh.f32 %v4843_v50  ;;  %v4003_v59 = vpop.eup %4002 }
 0x356   :  { %4006 = vrcp.f32 %v1514_v55 }
 0x357   :  { %v4847_v61 = vadd.f32 %v1532_v60, %v1530_v0  ;;  %v5102_v60 = vld [vmem:[#allocation25_spill] sm:$0xff] }
 0x358   :  { %v5103_v0 = vld [vmem:[#allocation29_spill] sm:$0xff] }
 0x359   :  { %4008 = vtanh.f32 %v4847_v61 }
 0x362   :  { %v4005_v2 = vpop.eup %4004 }
 0x363   :  { %v4007_v12 = vpop.eup %4006  ;;  %v1537_v7 = vmul.f32 %v4005_v2, %v4003_v59 }
 0x366   :  { %v4009_v1 = vpop.eup %4008 }
 0x367   :  { %v1538_v34 = vmul.f32 %v4009_v1, %v4007_v12  ;;  %v5104_v12 = vld [vmem:[#allocation27_spill] sm:$0xff] }
 0x369   :  { %v1539_v35 = vpack.c.bf16 %v1538_v34, %v1537_v7 }
 0x36b   :  { %3720 = vst [vmem:[#allocation11 + $0x10] sm:$0xff] %v1539_v35   ;;  %1784 = vmatmul.mubr.bf16.vlgmr.msra.gmra.mxu0 %v1539_v35  ;;  %1827 = vmatmul.mubr.bf16.vlgmr.msra.gmra.mxu1 %v1539_v35 }
 0x36c   :  { %2106 = vmatpush1.bf16.msra.mxu0 %v4740_v63  ;;  %2149 = vmatpush1.bf16.msra.mxu1 %v4742_v45 }
 0x36d   :  { %2107 = vmatprep.subr.bf16.mxu0 %v4748_v54  ;;  %2150 = vmatprep.subr.bf16.mxu1 %v4750_v47 }
 0x36e   :  { %2137 = vmatprep.mubr.bf16.mxu0 %v5088_v51  ;;  %2180 = vmatprep.mubr.bf16.mxu1 %v5088_v51 }
 0x370   :  { %2108 = vmatpush1.bf16.msra.mxu0 %v4752_v49  ;;  %2151 = vmatpush1.bf16.msra.mxu1 %v4754_v52 }
 0x371   :  { %2109 = vmatprep.subr.bf16.mxu0 %v4760_v58  ;;  %2152 = vmatprep.subr.bf16.mxu1 %v4762_v6 }
 0x374   :  { %2110 = vmatpush1.bf16.msra.mxu0 %v4764_v8  ;;  %2153 = vmatpush1.bf16.msra.mxu1 %v4766_v9 }
 0x375   :  { %2111 = vmatprep.subr.bf16.mxu0 %v4772_v10  ;;  %2154 = vmatprep.subr.bf16.mxu1 %v4774_v11 }
 0x378   :  { %2112 = vmatpush1.bf16.msra.mxu0 %v4776_v14  ;;  %2155 = vmatpush1.bf16.msra.mxu1 %v4778_v15 }
 0x379   :  { %2113 = vmatprep.subr.bf16.mxu0 %v4782_v16  ;;  %2156 = vmatprep.subr.bf16.mxu1 %v4784_v17 }
 0x37c   :  { %2114 = vmatpush1.bf16.msra.mxu0 %v4788_v18  ;;  %2157 = vmatpush1.bf16.msra.mxu1 %v4790_v19 }
 0x37d   :  { %2115 = vmatprep.subr.bf16.mxu0 %v4794_v20  ;;  %2158 = vmatprep.subr.bf16.mxu1 %v4796_v21 }
 0x380   :  { %2116 = vmatpush1.bf16.msra.mxu0 %v4800_v23  ;;  %2159 = vmatpush1.bf16.msra.mxu1 %v4802_v24 }
 0x381   :  { %2117 = vmatprep.subr.bf16.mxu0 %v4806_v25  ;;  %2160 = vmatprep.subr.bf16.mxu1 %v4808_v26 }
 0x384   :  { %2118 = vmatpush1.bf16.msra.mxu0 %v4812_v27  ;;  %2161 = vmatpush1.bf16.msra.mxu1 %v4814_v28 }
 0x385   :  { %2119 = vmatprep.subr.bf16.mxu0 %v4818_v29  ;;  %2162 = vmatprep.subr.bf16.mxu1 %v4820_v30 }
 0x388   :  { %2120 = vmatpush1.bf16.msra.mxu0 %v4824_v32  ;;  %2163 = vmatpush1.bf16.msra.mxu1 %v4826_v33 }
 0x389   :  { %2459 = vmatprep.subr.bf16.mxu0 %v4736_v44  ;;  %2502 = vmatprep.subr.bf16.mxu1 %v4738_v53 }
 0x42b   :  { %v1785_v31 = vpop.f32.mrf.mxu0  ;;  %v1828_v40 = vpop.f32.mrf.mxu1 }
 0x42c   :  { %v1837_v37 = vadd.f32 %v1785_v31, %v5098_v36  ;;  %v1839_v3 = vadd.f32 %v1828_v40, %v5102_v60 }
 0x42d   :  { %v1787_v38 = vpop.f32.mrf.mxu0  ;;  %v1830_v56 = vpop.f32.mrf.mxu1 }
 0x42e   :  { %v3522_v41 = vmul.f32 -1.442695, %v1837_v37  ;;  %v1838_v5 = vadd.f32 %v1787_v38, %v5099_v4  ;;  %v3524_v2 = vmul.f32 -1.442695, %v1839_v3  ;;  %v1840_v1 = vadd.f32 %v1830_v56, %v5104_v12  ;;  %v5105_v37 = vld [vmem:[#allocation31_spill] sm:$0xff] }
 0x42f   :  { %v1789_v13 = vpop.f32.mrf.mxu0  ;;  %v1832_v55 = vpop.f32.mrf.mxu1 }
 0x430   :  { %4010 = vpow2.f32 %v3522_v41  ;;  %v3523_v22 = vmul.f32 -1.442695, %v1838_v5  ;;  %v1841_v43 = vadd.f32 %v1789_v13, %v5100_v42  ;;  %v1843_v59 = vadd.f32 %v1832_v55, %v5103_v0 }
 0x431   :  { %v1791_v46 = vpop.f32.mrf.mxu0  ;;  %v1834_v7 = vpop.f32.mrf.mxu1 }
 0x432   :  { %4012 = vpow2.f32 %v3523_v22  ;;  %v3525_v62 = vmul.f32 -1.442695, %v1841_v43  ;;  %v1842_v48 = vadd.f32 %v1791_v46, %v5101_v57  ;;  %v3527_v35 = vmul.f32 -1.442695, %v1843_v59 }
 0x433   :  { %v1844_v38 = vadd.f32 %v1834_v7, %v5105_v37  ;;  %v5106_v37 = vld [vmem:[#allocation32_spill] sm:$0xff] }
 0x434   :  { %4014 = vpow2.f32 %v3525_v62  ;;  %v3526_v39 = vmul.f32 -1.442695, %v1842_v48 }
 0x436   :  { %4016 = vpow2.f32 %v3526_v39 }
 0x437   :  { %4018 = vpow2.f32 %v3524_v2 }
 0x438   :  { %4020 = vtanh.f32 %v1840_v1 }
 0x43d   :  { %v4011_v34 = vpop.eup %4010 }
 0x43e   :  { %v1863_v31 = vadd.f32 1.0, %v4011_v34 }
 0x43f   :  { %v4013_v36 = vpop.eup %4012 }
 0x440   :  { %4022 = vrcp.f32 %v1863_v31  ;;  %v1864_v41 = vadd.f32 1.0, %v4013_v36 }
 0x441   :  { %v4015_v4 = vpop.eup %4014  ;;  %4024 = vpow2.f32 %v3527_v35 }
 0x442   :  { %4026 = vrcp.f32 %v1864_v41  ;;  %v1866_v40 = vadd.f32 1.0, %v4015_v4 }
 0x443   :  { %v4017_v5 = vpop.eup %4016  ;;  %4028 = vtanh.f32 %v1844_v38 }
 0x444   :  { %4030 = vrcp.f32 %v1866_v40  ;;  %v1867_v13 = vadd.f32 1.0, %v4017_v5  ;;  %v4019_v22 = vpop.eup %4018  ;;  %v5107_v5 = vld [vmem:[#allocation34_spill] sm:$0xff] }
 0x445   :  { %v4021_v42 = vpop.eup %4020  ;;  %v1865_v60 = vadd.f32 1.0, %v4019_v22 }
 0x446   :  { %4032 = vrcp.f32 %v1867_v13 }
 0x447   :  { %4034 = vrcp.f32 %v1865_v60 }
 0x44d   :  { %v4023_v43 = vpop.eup %4022 }
 0x44e   :  { %v4025_v46 = vpop.eup %4024  ;;  %v1885_v56 = vmul.f32 %v4023_v43, %v4021_v42  ;;  %v5108_v43 = vld [vmem:[#allocation36_spill] sm:$0xff] }
 0x44f   :  { %v4027_v62 = vpop.eup %4026  ;;  %v1868_v59 = vadd.f32 1.0, %v4025_v46 }
 0x450   :  { %v4029_v57 = vpop.eup %4028  ;;  %v1883_v48 = vmul.f32 %v4027_v62, %v4843_v50 }
 0x451   :  { %v4031_v39 = vpop.eup %4030 }
 0x452   :  { %v4893_v3 = vadd.f32 %v1885_v56, %v1883_v48  ;;  %v1886_v55 = vmul.f32 %v4031_v39, %v4029_v57  ;;  %v5110_v39 = vld [vmem:[#allocation33_spill] sm:$0xff] }
 0x453   :  { %v4033_v0 = vpop.eup %4032 }
 0x454   :  { %v1884_v2 = vmul.f32 %v4033_v0, %v4847_v61  ;;  %4036 = vtanh.f32 %v4893_v3  ;;  %v4035_v1 = vpop.eup %4034  ;;  %v5111_v0 = vld [vmem:[#allocation37_spill] sm:$0xff] }
 0x455   :  { %4038 = vrcp.f32 %v1868_v59 }
 0x456   :  { %v4897_v12 = vadd.f32 %v1886_v55, %v1884_v2 }
 0x458   :  { %4040 = vtanh.f32 %v4897_v12 }
 0x461   :  { %v4037_v7 = vpop.eup %4036 }
 0x462   :  { %v4039_v50 = vpop.eup %4038  ;;  %v1891_v35 = vmul.f32 %v4037_v7, %v4035_v1  ;;  %v5112_v1 = vld [vmem:[#allocation35_spill] sm:$0xff] }
 0x465   :  { %v4041_v34 = vpop.eup %4040 }
 0x466   :  { %v1892_v31 = vmul.f32 %v4041_v34, %v4039_v50 }
 0x468   :  { %v1893_v36 = vpack.c.bf16 %v1892_v31, %v1891_v35 }
 0x46a   :  { %3725 = vst [vmem:[#allocation11 + $0x18] sm:$0xff] %v1893_v36   ;;  %2138 = vmatmul.mubr.bf16.vlgmr.msra.gmra.mxu0 %v1893_v36  ;;  %2181 = vmatmul.mubr.bf16.vlgmr.msra.gmra.mxu1 %v1893_v36 }
 0x46b   :  { %2460 = vmatpush1.bf16.msra.mxu0 %v4740_v63  ;;  %2503 = vmatpush1.bf16.msra.mxu1 %v4742_v45 }
 0x46c   :  { %2461 = vmatprep.subr.bf16.mxu0 %v4748_v54  ;;  %2504 = vmatprep.subr.bf16.mxu1 %v4750_v47 }
 0x46d   :  { %2491 = vmatprep.mubr.bf16.mxu0 %v5088_v51  ;;  %2534 = vmatprep.mubr.bf16.mxu1 %v5088_v51 }
 0x46f   :  { %2462 = vmatpush1.bf16.msra.mxu0 %v4752_v49  ;;  %2505 = vmatpush1.bf16.msra.mxu1 %v4754_v52 }
 0x470   :  { %2463 = vmatprep.subr.bf16.mxu0 %v4760_v58  ;;  %2506 = vmatprep.subr.bf16.mxu1 %v4762_v6 }
 0x473   :  { %2464 = vmatpush1.bf16.msra.mxu0 %v4764_v8  ;;  %2507 = vmatpush1.bf16.msra.mxu1 %v4766_v9 }
 0x474   :  { %2465 = vmatprep.subr.bf16.mxu0 %v4772_v10  ;;  %2508 = vmatprep.subr.bf16.mxu1 %v4774_v11 }
 0x477   :  { %2466 = vmatpush1.bf16.msra.mxu0 %v4776_v14  ;;  %2509 = vmatpush1.bf16.msra.mxu1 %v4778_v15 }
 0x478   :  { %2467 = vmatprep.subr.bf16.mxu0 %v4782_v16  ;;  %2510 = vmatprep.subr.bf16.mxu1 %v4784_v17 }
 0x47b   :  { %2468 = vmatpush1.bf16.msra.mxu0 %v4788_v18  ;;  %2511 = vmatpush1.bf16.msra.mxu1 %v4790_v19 }
 0x47c   :  { %2469 = vmatprep.subr.bf16.mxu0 %v4794_v20  ;;  %2512 = vmatprep.subr.bf16.mxu1 %v4796_v21 }
 0x47f   :  { %2470 = vmatpush1.bf16.msra.mxu0 %v4800_v23  ;;  %2513 = vmatpush1.bf16.msra.mxu1 %v4802_v24 }
 0x480   :  { %2471 = vmatprep.subr.bf16.mxu0 %v4806_v25  ;;  %2514 = vmatprep.subr.bf16.mxu1 %v4808_v26 }
 0x483   :  { %2472 = vmatpush1.bf16.msra.mxu0 %v4812_v27  ;;  %2515 = vmatpush1.bf16.msra.mxu1 %v4814_v28 }
 0x484   :  { %2473 = vmatprep.subr.bf16.mxu0 %v4818_v29  ;;  %2516 = vmatprep.subr.bf16.mxu1 %v4820_v30 }
 0x487   :  { %2474 = vmatpush1.bf16.msra.mxu0 %v4824_v32  ;;  %2517 = vmatpush1.bf16.msra.mxu1 %v4826_v33 }
 0x488   :  { %2813 = vmatprep.subr.bf16.mxu0 %v4736_v44  ;;  %2856 = vmatprep.subr.bf16.mxu1 %v4738_v53  ;;  %v5109_v44 = vld [vmem:[#allocation38_spill] sm:$0xff] }
 0x52a   :  { %v2139_v61 = vpop.f32.mrf.mxu0  ;;  %v2182_v40 = vpop.f32.mrf.mxu1 }
 0x52b   :  { %v2191_v38 = vadd.f32 %v2139_v61, %v5106_v37  ;;  %v2193_v60 = vadd.f32 %v2182_v40, %v5110_v39  ;;  %v5113_v61 = vld [vmem:[#allocation39_spill] sm:$0xff] }
 0x52c   :  { %v2141_v41 = vpop.f32.mrf.mxu0  ;;  %v2184_v62 = vpop.f32.mrf.mxu1 }
 0x52d   :  { %v3562_v4 = vmul.f32 -1.442695, %v2191_v38  ;;  %v2192_v13 = vadd.f32 %v2141_v41, %v5107_v5  ;;  %v3564_v2 = vmul.f32 -1.442695, %v2193_v60  ;;  %v2194_v7 = vadd.f32 %v2184_v62, %v5112_v1 }
 0x52e   :  { %v2143_v22 = vpop.f32.mrf.mxu0  ;;  %v2186_v55 = vpop.f32.mrf.mxu1 }
 0x52f   :  { %4042 = vpow2.f32 %v3562_v4  ;;  %v3563_v42 = vmul.f32 -1.442695, %v2192_v13  ;;  %v2195_v46 = vadd.f32 %v2143_v22, %v5108_v43  ;;  %v2197_v59 = vadd.f32 %v2186_v55, %v5111_v0 }
 0x530   :  { %v2145_v56 = vpop.f32.mrf.mxu0  ;;  %v2188_v50 = vpop.f32.mrf.mxu1 }
 0x531   :  { %4044 = vpow2.f32 %v3563_v42  ;;  %v3565_v57 = vmul.f32 -1.442695, %v2195_v46  ;;  %v2196_v48 = vadd.f32 %v2145_v56, %v5109_v44  ;;  %v3567_v35 = vmul.f32 -1.442695, %v2197_v59 }
 0x532   :  { %v2198_v37 = vadd.f32 %v2188_v50, %v5113_v61 }
 0x533   :  { %4046 = vpow2.f32 %v3565_v57  ;;  %v3566_v53 = vmul.f32 -1.442695, %v2196_v48 }
 0x535   :  { %4048 = vpow2.f32 %v3566_v53 }
 0x536   :  { %4050 = vpow2.f32 %v3564_v2 }
 0x537   :  { %4052 = vtanh.f32 %v2194_v7 }
 0x53c   :  { %v4043_v34 = vpop.eup %4042 }
 0x53d   :  { %v2217_v31 = vadd.f32 1.0, %v4043_v34 }
 0x53e   :  { %v4045_v36 = vpop.eup %4044 }
 0x53f   :  { %4054 = vrcp.f32 %v2217_v31  ;;  %v2218_v38 = vadd.f32 1.0, %v4045_v36  ;;  %v5121_v31 = vld [vmem:[#allocation47_spill] sm:$0xff] }
 0x540   :  { %v4047_v41 = vpop.eup %4046  ;;  %4056 = vpow2.f32 %v3567_v35 }
 0x541   :  { %4058 = vrcp.f32 %v2218_v38  ;;  %v2220_v4 = vadd.f32 1.0, %v4047_v41 }
 0x542   :  { %v4049_v40 = vpop.eup %4048  ;;  %4060 = vtanh.f32 %v2198_v37 }
 0x543   :  { %4062 = vrcp.f32 %v2220_v4  ;;  %v2221_v5 = vadd.f32 1.0, %v4049_v40  ;;  %v4051_v13 = vpop.eup %4050 }
 0x544   :  { %v4053_v22 = vpop.eup %4052  ;;  %v2219_v48 = vadd.f32 1.0, %v4051_v13 }
 0x545   :  { %4064 = vrcp.f32 %v2221_v5 }
 0x546   :  { %4066 = vrcp.f32 %v2219_v48 }
 0x54c   :  { %v4055_v42 = vpop.eup %4054 }
 0x54d   :  { %v4057_v43 = vpop.eup %4056  ;;  %v2239_v46 = vmul.f32 %v4055_v42, %v4053_v22 }
 0x54e   :  { %v4059_v56 = vpop.eup %4058  ;;  %v2222_v55 = vadd.f32 1.0, %v4057_v43 }
 0x54f   :  { %v4061_v62 = vpop.eup %4060  ;;  %v2237_v57 = vmul.f32 %v4059_v56, %v4893_v3 }
 0x550   :  { %v4063_v44 = vpop.eup %4062 }
 0x551   :  { %v4943_v53 = vadd.f32 %v2239_v46, %v2237_v57  ;;  %v2240_v39 = vmul.f32 %v4063_v44, %v4061_v62 }
 0x552   :  { %v4065_v60 = vpop.eup %4064 }
 0x553   :  { %v2238_v0 = vmul.f32 %v4065_v60, %v4897_v12  ;;  %4068 = vtanh.f32 %v4943_v53  ;;  %v4067_v2 = vpop.eup %4066 }
 0x554   :  { %4070 = vrcp.f32 %v2222_v55 }
 0x555   :  { %v4947_v59 = vadd.f32 %v2240_v39, %v2238_v0 }
 0x557   :  { %4072 = vtanh.f32 %v4947_v59 }
 0x560   :  { %v4069_v1 = vpop.eup %4068 }
 0x561   :  { %v4071_v3 = vpop.eup %4070  ;;  %v2245_v50 = vmul.f32 %v4069_v1, %v4067_v2 }
 0x564   :  { %v4073_v7 = vpop.eup %4072 }
 0x565   :  { %v2246_v34 = vmul.f32 %v4073_v7, %v4071_v3 }
 0x567   :  { %v2247_v35 = vpack.c.bf16 %v2246_v34, %v2245_v50 }
 0x569   :  { %3730 = vst [vmem:[#allocation11 + $0x20] sm:$0xff] %v2247_v35   ;;  %2492 = vmatmul.mubr.bf16.vlgmr.msra.gmra.mxu0 %v2247_v35  ;;  %2535 = vmatmul.mubr.bf16.vlgmr.msra.gmra.mxu1 %v2247_v35  ;;  %v3871_v35 = vld [vmem:[#allocation10 + $0xec] ss:$16 sps:$4 sm:$0xff]  }
 0x56a   :  { %2814 = vmatpush1.bf16.msra.mxu0 %v4740_v63  ;;  %2857 = vmatpush1.bf16.msra.mxu1 %v4742_v45  ;;  %v5114_v45 = vld [vmem:[#allocation40_spill] sm:$0xff] }
 0x56b   :  { %2815 = vmatprep.subr.bf16.mxu0 %v4748_v54  ;;  %2858 = vmatprep.subr.bf16.mxu1 %v4750_v47 }
 0x56c   :  { %2845 = vmatprep.mubr.bf16.mxu0 %v5088_v51  ;;  %2888 = vmatprep.mubr.bf16.mxu1 %v5088_v51 }
 0x56e   :  { %2816 = vmatpush1.bf16.msra.mxu0 %v4752_v49  ;;  %2859 = vmatpush1.bf16.msra.mxu1 %v4754_v52 }
 0x56f   :  { %2817 = vmatprep.subr.bf16.mxu0 %v4760_v58  ;;  %2860 = vmatprep.subr.bf16.mxu1 %v4762_v6  ;;  %v5115_v58 = vld [vmem:[#allocation42_spill] sm:$0xff] }
 0x572   :  { %2818 = vmatpush1.bf16.msra.mxu0 %v4764_v8  ;;  %2861 = vmatpush1.bf16.msra.mxu1 %v4766_v9 }
 0x573   :  { %2819 = vmatprep.subr.bf16.mxu0 %v4772_v10  ;;  %2862 = vmatprep.subr.bf16.mxu1 %v4774_v11  ;;  %v5116_v10 = vld [vmem:[#allocation44_spill] sm:$0xff] }
 0x576   :  { %2820 = vmatpush1.bf16.msra.mxu0 %v4776_v14  ;;  %2863 = vmatpush1.bf16.msra.mxu1 %v4778_v15 }
 0x577   :  { %2821 = vmatprep.subr.bf16.mxu0 %v4782_v16  ;;  %2864 = vmatprep.subr.bf16.mxu1 %v4784_v17  ;;  %v5117_v17 = vld [vmem:[#allocation46_spill] sm:$0xff] }
 0x57a   :  { %2822 = vmatpush1.bf16.msra.mxu0 %v4788_v18  ;;  %2865 = vmatpush1.bf16.msra.mxu1 %v4790_v19 }
 0x57b   :  { %2823 = vmatprep.subr.bf16.mxu0 %v4794_v20  ;;  %2866 = vmatprep.subr.bf16.mxu1 %v4796_v21  ;;  %v5118_v20 = vld [vmem:[#allocation41_spill] sm:$0xff] }
 0x57e   :  { %2824 = vmatpush1.bf16.msra.mxu0 %v4800_v23  ;;  %2867 = vmatpush1.bf16.msra.mxu1 %v4802_v24  ;;  %v5119_v24 = vld [vmem:[#allocation45_spill] sm:$0xff] }
 0x57f   :  { %2825 = vmatprep.subr.bf16.mxu0 %v4806_v25  ;;  %2868 = vmatprep.subr.bf16.mxu1 %v4808_v26 }
 0x582   :  { %2826 = vmatpush1.bf16.msra.mxu0 %v4812_v27  ;;  %2869 = vmatpush1.bf16.msra.mxu1 %v4814_v28  ;;  %v5120_v27 = vld [vmem:[#allocation43_spill] sm:$0xff] }
 0x583   :  { %2827 = vmatprep.subr.bf16.mxu0 %v4818_v29  ;;  %2870 = vmatprep.subr.bf16.mxu1 %v4820_v30 }
 0x586   :  { %2828 = vmatpush1.bf16.msra.mxu0 %v4824_v32  ;;  %2871 = vmatpush1.bf16.msra.mxu1 %v4826_v33 }
 0x587   :  { %3210 = vmatprep.subr.bf16.mxu1 %v3871_v35  ;;  %v5129_v35 = vld [vmem:[#allocation55_spill] sm:$0xff] }
 0x629   :  { %v2493_v63 = vpop.f32.mrf.mxu0  ;;  %v2536_v52 = vpop.f32.mrf.mxu1 }
 0x62a   :  { %v2545_v54 = vadd.f32 %v2493_v63, %v5114_v45  ;;  %v2547_v21 = vadd.f32 %v2536_v52, %v5118_v20  ;;  %v3866_v63 = vld [vmem:[#allocation10 + $0xe0] ss:$16 sps:$4 sm:$0xff]   ;;  %v3869_v45 = vld [vmem:[#allocation10 + $0xe8] ss:$16 sps:$4 sm:$0xff]   ;;  %v3901_v20 = vld [vmem:[#allocation10 + $0x4c] ss:$16 sps:$4 sm:$0xff]  }
 0x62b   :  { %v2495_v47 = vpop.f32.mrf.mxu0  ;;  %v2538_v15 = vpop.f32.mrf.mxu1  ;;  %v3875_v52 = vld [vmem:[#allocation10 + $0xc8] ss:$16 sps:$4 sm:$0xff]  }
 0x62c   :  { %v3602_v49 = vmul.f32 -1.442695, %v2545_v54  ;;  %v2546_v6 = vadd.f32 %v2495_v47, %v5115_v58  ;;  %v3604_v26 = vmul.f32 -1.442695, %v2547_v21  ;;  %v2548_v28 = vadd.f32 %v2538_v15, %v5120_v27  ;;  %v3874_v54 = vld [vmem:[#allocation10 + $0xc4] ss:$16 sps:$4 sm:$0xff]  }
 0x62d   :  { %v2497_v8 = vpop.f32.mrf.mxu0  ;;  %v2540_v23 = vpop.f32.mrf.mxu1  ;;  %v3877_v47 = vld [vmem:[#allocation10 + $0xcc] ss:$16 sps:$4 sm:$0xff]   ;;  %v3880_v58 = vld [vmem:[#allocation10 + $0xa4] ss:$16 sps:$4 sm:$0xff]   ;;  %v3896_v21 = vld [vmem:[#allocation10 + $0x40] ss:$16 sps:$4 sm:$0xff]  }
 0x62e   :  { %4074 = vpow2.f32 %v3602_v49  ;;  %v3603_v9 = vmul.f32 -1.442695, %v2546_v6  ;;  %v2549_v11 = vadd.f32 %v2497_v8, %v5116_v10  ;;  %v2551_v25 = vadd.f32 %v2540_v23, %v5119_v24  ;;  %v3872_v49 = vld [vmem:[#allocation10 + $0xc0] ss:$16 sps:$4 sm:$0xff]   ;;  %v3883_v6 = vld [vmem:[#allocation10 + $0xac] ss:$16 sps:$4 sm:$0xff]  }
 0x62f   :  { %v2499_v14 = vpop.f32.mrf.mxu0  ;;  %v2542_v29 = vpop.f32.mrf.mxu1  ;;  %v3878_v8 = vld [vmem:[#allocation10 + $0xa0] ss:$16 sps:$4 sm:$0xff]   ;;  %v3889_v10 = vld [vmem:[#allocation10 + $0x8c] ss:$16 sps:$4 sm:$0xff]   ;;  %v3892_v15 = vld [vmem:[#allocation10 + $0x64] ss:$16 sps:$4 sm:$0xff]  }
 0x630   :  { %4076 = vpow2.f32 %v3603_v9  ;;  %v3605_v16 = vmul.f32 -1.442695, %v2549_v11  ;;  %v2550_v18 = vadd.f32 %v2499_v14, %v5117_v17  ;;  %v3607_v32 = vmul.f32 -1.442695, %v2551_v25  ;;  %v3886_v9 = vld [vmem:[#allocation10 + $0x84] ss:$16 sps:$4 sm:$0xff]  }
 0x631   :  { %v2552_v36 = vadd.f32 %v2542_v29, %v5121_v31  ;;  %v3884_v11 = vld [vmem:[#allocation10 + $0x80] ss:$16 sps:$4 sm:$0xff]   ;;  %v3887_v14 = vld [vmem:[#allocation10 + $0x88] ss:$16 sps:$4 sm:$0xff]   ;;  %v3904_v24 = vld [vmem:[#allocation10 + $0x24] ss:$16 sps:$4 sm:$0xff]  }
 0x632   :  { %4078 = vpow2.f32 %v3605_v16  ;;  %v3606_v19 = vmul.f32 -1.442695, %v2550_v18  ;;  %v3895_v16 = vld [vmem:[#allocation10 + $0x6c] ss:$16 sps:$4 sm:$0xff]   ;;  %v3890_v17 = vld [vmem:[#allocation10 + $0x60] ss:$16 sps:$4 sm:$0xff]  }
 0x633   :  { %v3893_v18 = vld [vmem:[#allocation10 + $0x68] ss:$16 sps:$4 sm:$0xff]   ;;  %v3907_v25 = vld [vmem:[#allocation10 + $0x2c] ss:$16 sps:$4 sm:$0xff]  }
 0x634   :  { %4080 = vpow2.f32 %v3606_v19  ;;  %v3898_v19 = vld [vmem:[#allocation10 + $0x44] ss:$16 sps:$4 sm:$0xff]   ;;  %v3899_v23 = vld [vmem:[#allocation10 + $0x48] ss:$16 sps:$4 sm:$0xff]   ;;  %v3913_v29 = vld [vmem:[#allocation10 + $0xc] ss:$16 sps:$4 sm:$0xff]  }
 0x635   :  { %4082 = vpow2.f32 %v3604_v26  ;;  %v3902_v26 = vld [vmem:[#allocation10 + $0x20] ss:$16 sps:$4 sm:$0xff]   ;;  %v3905_v27 = vld [vmem:[#allocation10 + $0x28] ss:$16 sps:$4 sm:$0xff]  }
 0x636   :  { %4084 = vtanh.f32 %v2548_v28  ;;  %v3910_v28 = vld [vmem:[#allocation10 + $0x4] ss:$16 sps:$4 sm:$0xff]  }
 0x63b   :  { %v4075_v30 = vpop.eup %4074 }
 0x63c   :  { %v2571_v33 = vadd.f32 1.0, %v4075_v30  ;;  %v3908_v30 = vld [vmem:[#allocation10] ss:$16 sps:$4 sm:$0xff]  }
 0x63d   :  { %v4077_v12 = vpop.eup %4076 }
 0x63e   :  { %4086 = vrcp.f32 %v2571_v33  ;;  %v2572_v61 = vadd.f32 1.0, %v4077_v12  ;;  %v5122_v12 = vld [vmem:[#allocation48_spill] sm:$0xff] }
 0x63f   :  { %v4079_v37 = vpop.eup %4078  ;;  %4088 = vpow2.f32 %v3607_v32  ;;  %v3911_v32 = vld [vmem:[#allocation10 + $0x8] ss:$16 sps:$4 sm:$0xff]  }
 0x640   :  { %4090 = vrcp.f32 %v2572_v61  ;;  %v2574_v38 = vadd.f32 1.0, %v4079_v37 }
 0x641   :  { %v4081_v41 = vpop.eup %4080  ;;  %4092 = vtanh.f32 %v2552_v36 }
 0x642   :  { %4094 = vrcp.f32 %v2574_v38  ;;  %v2575_v4 = vadd.f32 1.0, %v4081_v41  ;;  %v4083_v40 = vpop.eup %4082  ;;  %v5123_v38 = vld [vmem:[#allocation50_spill] sm:$0xff] }
 0x643   :  { %v4085_v5 = vpop.eup %4084  ;;  %v2573_v57 = vadd.f32 1.0, %v4083_v40 }
 0x644   :  { %4096 = vrcp.f32 %v2575_v4 }
 0x645   :  { %4098 = vrcp.f32 %v2573_v57  ;;  %v5126_v57 = vld [vmem:[#allocation49_spill] sm:$0xff] }
 0x64b   :  { %v4087_v13 = vpop.eup %4086 }
 0x64c   :  { %v4089_v22 = vpop.eup %4088  ;;  %v2593_v42 = vmul.f32 %v4087_v13, %v4085_v5  ;;  %v5124_v5 = vld [vmem:[#allocation52_spill] sm:$0xff] }
 0x64d   :  { %v4091_v43 = vpop.eup %4090  ;;  %v2576_v60 = vadd.f32 1.0, %v4089_v22 }
 0x64e   :  { %v4093_v46 = vpop.eup %4092  ;;  %v2591_v56 = vmul.f32 %v4091_v43, %v4943_v53 }
 0x64f   :  { %v4095_v62 = vpop.eup %4094 }
 0x650   :  { %v4991_v44 = vadd.f32 %v2593_v42, %v2591_v56  ;;  %v2594_v48 = vmul.f32 %v4095_v62, %v4093_v46  ;;  %v5125_v46 = vld [vmem:[#allocation54_spill] sm:$0xff] }
 0x651   :  { %v4097_v39 = vpop.eup %4096 }
 0x652   :  { %v2592_v55 = vmul.f32 %v4097_v39, %v4947_v59  ;;  %4100 = vtanh.f32 %v4991_v44  ;;  %v4099_v2 = vpop.eup %4098  ;;  %v3868_v59 = vld [vmem:[#allocation10 + $0xe4] ss:$16 sps:$4 sm:$0xff]  }
 0x653   :  { %4102 = vrcp.f32 %v2576_v60  ;;  %3167 = vmatprep.subr.bf16.mxu0 %v3868_v59  ;;  %v5127_v60 = vld [vmem:[#allocation53_spill] sm:$0xff] }
 0x654   :  { %v4995_v0 = vadd.f32 %v2594_v48, %v2592_v55 }
 0x656   :  { %4104 = vtanh.f32 %v4995_v0 }
 0x65f   :  { %v4101_v1 = vpop.eup %4100 }
 0x660   :  { %v4103_v53 = vpop.eup %4102  ;;  %v2599_v7 = vmul.f32 %v4101_v1, %v4099_v2  ;;  %v5128_v1 = vld [vmem:[#allocation51_spill] sm:$0xff] }
 0x663   :  { %v4105_v3 = vpop.eup %4104 }
 0x664   :  { %v2600_v50 = vmul.f32 %v4105_v3, %v4103_v53 }
 0x666   :  { %v2601_v34 = vpack.c.bf16 %v2600_v50, %v2599_v7 }
 0x668   :  { %3735 = vst [vmem:[#allocation11 + $0x28] sm:$0xff] %v2601_v34   ;;  %2846 = vmatmul.mubr.bf16.vlgmr.msra.gmra.mxu0 %v2601_v34  ;;  %2889 = vmatmul.mubr.bf16.vlgmr.msra.gmra.mxu1 %v2601_v34 }
 0x669   :  { %3199 = vmatprep.mubr.bf16.mxu0 %v5088_v51  ;;  %3242 = vmatprep.mubr.bf16.mxu1 %v5088_v51  ;;  %v3881_v51 = vld [vmem:[#allocation10 + $0xa8] ss:$16 sps:$4 sm:$0xff]  }
 0x66a   :  { %3168 = vmatpush1.bf16.msra.mxu0 %v3866_v63  ;;  %3211 = vmatpush1.bf16.msra.mxu1 %v3869_v45 }
 0x66b   :  { %3169 = vmatprep.subr.bf16.mxu0 %v3874_v54  ;;  %3212 = vmatprep.subr.bf16.mxu1 %v3877_v47 }
 0x66e   :  { %3170 = vmatpush1.bf16.msra.mxu0 %v3872_v49  ;;  %3213 = vmatpush1.bf16.msra.mxu1 %v3875_v52 }
 0x66f   :  { %3171 = vmatprep.subr.bf16.mxu0 %v3880_v58  ;;  %3214 = vmatprep.subr.bf16.mxu1 %v3883_v6 }
 0x672   :  { %3172 = vmatpush1.bf16.msra.mxu0 %v3878_v8  ;;  %3215 = vmatpush1.bf16.msra.mxu1 %v3881_v51 }
 0x673   :  { %3173 = vmatprep.subr.bf16.mxu0 %v3886_v9  ;;  %3216 = vmatprep.subr.bf16.mxu1 %v3889_v10 }
 0x676   :  { %3174 = vmatpush1.bf16.msra.mxu0 %v3884_v11  ;;  %3217 = vmatpush1.bf16.msra.mxu1 %v3887_v14 }
 0x677   :  { %3175 = vmatprep.subr.bf16.mxu0 %v3892_v15  ;;  %3218 = vmatprep.subr.bf16.mxu1 %v3895_v16 }
 0x67a   :  { %3176 = vmatpush1.bf16.msra.mxu0 %v3890_v17  ;;  %3219 = vmatpush1.bf16.msra.mxu1 %v3893_v18 }
 0x67b   :  { %3177 = vmatprep.subr.bf16.mxu0 %v3898_v19  ;;  %3220 = vmatprep.subr.bf16.mxu1 %v3901_v20 }
 0x67e   :  { %3178 = vmatpush1.bf16.msra.mxu0 %v3896_v21  ;;  %3221 = vmatpush1.bf16.msra.mxu1 %v3899_v23 }
 0x67f   :  { %3179 = vmatprep.subr.bf16.mxu0 %v3904_v24  ;;  %3222 = vmatprep.subr.bf16.mxu1 %v3907_v25 }
 0x682   :  { %3180 = vmatpush1.bf16.msra.mxu0 %v3902_v26  ;;  %3223 = vmatpush1.bf16.msra.mxu1 %v3905_v27 }
 0x683   :  { %3181 = vmatprep.subr.bf16.mxu0 %v3910_v28  ;;  %3224 = vmatprep.subr.bf16.mxu1 %v3913_v29 }
 0x686   :  { %3182 = vmatpush1.bf16.msra.mxu0 %v3908_v30  ;;  %3225 = vmatpush1.bf16.msra.mxu1 %v3911_v32 }
 0x728   :  { %v2847_v33 = vpop.f32.mrf.mxu0  ;;  %v2890_v37 = vpop.f32.mrf.mxu1 }
 0x729   :  { %v2899_v31 = vadd.f32 %v2847_v33, %v5122_v12  ;;  %v2901_v48 = vadd.f32 %v2890_v37, %v5126_v57  ;;  %v5135_v57 = vld [vmem:[#allocation61_spill] sm:$0xff] }
 0x72a   :  { %v2849_v36 = vpop.f32.mrf.mxu0  ;;  %v2892_v42 = vpop.f32.mrf.mxu1 }
 0x72b   :  { %v3642_v61 = vmul.f32 -1.442695, %v2899_v31  ;;  %v2900_v41 = vadd.f32 %v2849_v36, %v5123_v38  ;;  %v3644_v2 = vmul.f32 -1.442695, %v2901_v48  ;;  %v2902_v53 = vadd.f32 %v2892_v42, %v5128_v1  ;;  %v5131_v36 = vld [vmem:[#allocation58_spill] sm:$0xff] }
 0x72c   :  { %v2851_v4 = vpop.f32.mrf.mxu0  ;;  %v2894_v39 = vpop.f32.mrf.mxu1 }
 0x72d   :  { %4106 = vpow2.f32 %v3642_v61  ;;  %v3643_v40 = vmul.f32 -1.442695, %v2900_v41  ;;  %v2903_v13 = vadd.f32 %v2851_v4, %v5124_v5  ;;  %v2905_v55 = vadd.f32 %v2894_v39, %v5127_v60  ;;  %v5132_v41 = vld [vmem:[#allocation60_spill] sm:$0xff]  ;;  %v5136_v60 = vld [vmem:[#allocation59_spill] sm:$0xff] }
 0x72e   :  { %v2853_v22 = vpop.f32.mrf.mxu0  ;;  %v2896_v3 = vpop.f32.mrf.mxu1 }
 0x72f   :  { %4108 = vpow2.f32 %v3643_v40  ;;  %v3645_v43 = vmul.f32 -1.442695, %v2903_v13  ;;  %v2904_v56 = vadd.f32 %v2853_v22, %v5125_v46  ;;  %v3647_v50 = vmul.f32 -1.442695, %v2905_v55  ;;  %v5133_v22 = vld [vmem:[#allocation62_spill] sm:$0xff]  ;;  %v5134_v46 = vld [vmem:[#allocation57_spill] sm:$0xff] }
 0x730   :  { %v2906_v63 = vadd.f32 %v2896_v3, %v5129_v35 }
 0x731   :  { %4110 = vpow2.f32 %v3645_v43  ;;  %v3646_v62 = vmul.f32 -1.442695, %v2904_v56 }
 0x733   :  { %4112 = vpow2.f32 %v3646_v62 }
 0x734   :  { %4114 = vpow2.f32 %v3644_v2 }
 0x735   :  { %4116 = vtanh.f32 %v2902_v53 }
 0x73a   :  { %v4107_v7 = vpop.eup %4106 }
 0x73b   :  { %v2925_v34 = vadd.f32 1.0, %v4107_v7 }
 0x73c   :  { %v4109_v59 = vpop.eup %4108 }
 0x73d   :  { %4118 = vrcp.f32 %v2925_v34  ;;  %v2926_v45 = vadd.f32 1.0, %v4109_v59 }
 0x73e   :  { %v4111_v54 = vpop.eup %4110  ;;  %4120 = vpow2.f32 %v3647_v50  ;;  %v5137_v50 = vld [vmem:[#allocation63_spill] sm:$0xff] }
 0x73f   :  { %4122 = vrcp.f32 %v2926_v45  ;;  %v2928_v47 = vadd.f32 1.0, %v4111_v54 }
 0x740   :  { %v4113_v49 = vpop.eup %4112  ;;  %4124 = vtanh.f32 %v2906_v63 }
 0x741   :  { %4126 = vrcp.f32 %v2928_v47  ;;  %v2929_v52 = vadd.f32 1.0, %v4113_v49  ;;  %v4115_v58 = vpop.eup %4114 }
 0x742   :  { %v4117_v6 = vpop.eup %4116  ;;  %v2927_v16 = vadd.f32 1.0, %v4115_v58 }
 0x743   :  { %4128 = vrcp.f32 %v2929_v52 }
 0x744   :  { %4130 = vrcp.f32 %v2927_v16 }
 0x74a   :  { %v4119_v8 = vpop.eup %4118 }
 0x74b   :  { %v4121_v51 = vpop.eup %4120  ;;  %v2947_v9 = vmul.f32 %v4119_v8, %v4117_v6 }
 0x74c   :  { %v4123_v10 = vpop.eup %4122  ;;  %v2930_v20 = vadd.f32 1.0, %v4121_v51 }
 0x74d   :  { %v4125_v11 = vpop.eup %4124  ;;  %v2945_v14 = vmul.f32 %v4123_v10, %v4991_v44 }
 0x74e   :  { %v4127_v15 = vpop.eup %4126 }
 0x74f   :  { %v5009_v17 = vadd.f32 %v2947_v9, %v2945_v14  ;;  %v2948_v18 = vmul.f32 %v4127_v15, %v4125_v11 }
 0x750   :  { %v4129_v19 = vpop.eup %4128 }
 0x751   :  { %v2946_v21 = vmul.f32 %v4129_v19, %v4995_v0  ;;  %4132 = vtanh.f32 %v5009_v17  ;;  %v4131_v24 = vpop.eup %4130  ;;  %v5130_v0 = vld [vmem:[#allocation56_spill] sm:$0xff] }
 0x752   :  { %4134 = vrcp.f32 %v2930_v20 }
 0x753   :  { %v5013_v23 = vadd.f32 %v2948_v18, %v2946_v21 }
 0x755   :  { %4136 = vtanh.f32 %v5013_v23 }
 0x75e   :  { %v4133_v25 = vpop.eup %4132 }
 0x75f   :  { %v4135_v44 = vpop.eup %4134  ;;  %v2953_v27 = vmul.f32 %v4133_v25, %v4131_v24 }
 0x762   :  { %v4137_v26 = vpop.eup %4136 }
 0x763   :  { %v2954_v28 = vmul.f32 %v4137_v26, %v4135_v44 }
 0x765   :  { %v2955_v29 = vpack.c.bf16 %v2954_v28, %v2953_v27 }
 0x767   :  { %3740 = vst [vmem:[#allocation11 + $0x30] sm:$0xff] %v2955_v29   ;;  %3200 = vmatmul.mubr.bf16.vlgmr.msra.gmra.mxu0 %v2955_v29  ;;  %3243 = vmatmul.mubr.bf16.vlgmr.msra.gmra.mxu1 %v2955_v29 }
 0x827   :  { %v3201_v30 = vpop.f32.mrf.mxu0  ;;  %v3244_v31 = vpop.f32.mrf.mxu1 }
 0x828   :  { %v3253_v32 = vadd.f32 %v3201_v30, %v5130_v0  ;;  %v3255_v56 = vadd.f32 %v3244_v31, %v5134_v46 }
 0x829   :  { %v3203_v33 = vpop.f32.mrf.mxu0  ;;  %v3246_v5 = vpop.f32.mrf.mxu1 }
 0x82a   :  { %v3682_v12 = vmul.f32 -1.442695, %v3253_v32  ;;  %v3254_v61 = vadd.f32 %v3203_v33, %v5131_v36  ;;  %v3684_v39 = vmul.f32 -1.442695, %v3255_v56  ;;  %v3256_v55 = vadd.f32 %v3246_v5, %v5136_v60 }
 0x82b   :  { %v3205_v37 = vpop.f32.mrf.mxu0  ;;  %v3248_v62 = vpop.f32.mrf.mxu1 }
 0x82c   :  { %4138 = vpow2.f32 %v3682_v12  ;;  %v3683_v38 = vmul.f32 -1.442695, %v3254_v61  ;;  %v3257_v4 = vadd.f32 %v3205_v37, %v5132_v41  ;;  %v3259_v48 = vadd.f32 %v3248_v62, %v5135_v57 }
 0x82d   :  { %v3207_v40 = vpop.f32.mrf.mxu0  ;;  %v3250_v2 = vpop.f32.mrf.mxu1 }
 0x82e   :  { %4140 = vpow2.f32 %v3683_v38  ;;  %v3685_v13 = vmul.f32 -1.442695, %v3257_v4  ;;  %v3258_v42 = vadd.f32 %v3207_v40, %v5133_v22  ;;  %v3687_v53 = vmul.f32 -1.442695, %v3259_v48 }
 0x82f   :  { %v3260_v34 = vadd.f32 %v3250_v2, %v5137_v50 }
 0x830   :  { %4142 = vpow2.f32 %v3685_v13  ;;  %v3686_v43 = vmul.f32 -1.442695, %v3258_v42 }
 0x832   :  { %4144 = vpow2.f32 %v3686_v43 }
 0x833   :  { %4146 = vpow2.f32 %v3684_v39 }
 0x834   :  { %4148 = vtanh.f32 %v3256_v55 }
 0x839   :  { %v4139_v1 = vpop.eup %4138 }
 0x83a   :  { %v3279_v3 = vadd.f32 1.0, %v4139_v1 }
 0x83b   :  { %v4141_v7 = vpop.eup %4140 }
 0x83c   :  { %4150 = vrcp.f32 %v3279_v3  ;;  %v3280_v59 = vadd.f32 1.0, %v4141_v7 }
 0x83d   :  { %v4143_v35 = vpop.eup %4142  ;;  %4152 = vpow2.f32 %v3687_v53 }
 0x83e   :  { %4154 = vrcp.f32 %v3280_v59  ;;  %v3282_v63 = vadd.f32 1.0, %v4143_v35 }
 0x83f   :  { %v4145_v45 = vpop.eup %4144  ;;  %4156 = vtanh.f32 %v3260_v34 }
 0x840   :  { %4158 = vrcp.f32 %v3282_v63  ;;  %v3283_v54 = vadd.f32 1.0, %v4145_v45  ;;  %v4147_v47 = vpop.eup %4146 }
 0x841   :  { %v4149_v49 = vpop.eup %4148  ;;  %v3281_v51 = vadd.f32 1.0, %v4147_v47 }
 0x842   :  { %4160 = vrcp.f32 %v3283_v54 }
 0x843   :  { %4162 = vrcp.f32 %v3281_v51 }
 0x849   :  { %v4151_v52 = vpop.eup %4150 }
 0x84a   :  { %v4153_v58 = vpop.eup %4152  ;;  %v3301_v6 = vmul.f32 %v4151_v52, %v4149_v49 }
 0x84b   :  { %v4155_v8 = vpop.eup %4154  ;;  %v3284_v18 = vadd.f32 1.0, %v4153_v58 }
 0x84c   :  { %v4157_v9 = vpop.eup %4156  ;;  %v3299_v10 = vmul.f32 %v4155_v8, %v5009_v17 }
 0x84d   :  { %v4159_v11 = vpop.eup %4158 }
 0x84e   :  { %v3303_v14 = vadd.f32 %v3301_v6, %v3299_v10  ;;  %v3302_v15 = vmul.f32 %v4159_v11, %v4157_v9 }
 0x84f   :  { %v4161_v16 = vpop.eup %4160 }
 0x850   :  { %4164 = vtanh.f32 %v3303_v14  ;;  %v3300_v19 = vmul.f32 %v4161_v16, %v5013_v23  ;;  %v4163_v21 = vpop.eup %4162 }
 0x851   :  { %4166 = vrcp.f32 %v3284_v18 }
 0x852   :  { %v3304_v20 = vadd.f32 %v3302_v15, %v3300_v19 }
 0x854   :  { %4168 = vtanh.f32 %v3304_v20 }
 0x85d   :  { %v4165_v24 = vpop.eup %4164 }
 0x85e   :  { %v3307_v25 = vmul.f32 %v4165_v24, %v4163_v21  ;;  %v4167_v44 = vpop.eup %4166 }
 0x861   :  { %v4169_v26 = vpop.eup %4168 }
 0x862   :  { %v3308_v17 = vmul.f32 %v4169_v26, %v4167_v44 }
 0x864   :  { %v3744_v27 = vpack.c.bf16 %v3308_v17, %v3307_v25 }
 0x866   :  { %3745 = vst [vmem:[#allocation11 + $0x38] sm:$0xff] %v3744_v27  }
 0x867   :  { %4241 = shalt.err (!%p4238_p5)
}
 0x868   :  { %3335 = dma.vmem_to_hbm [thread:$0]  %s3330_s7, 1024, %s5036_s4, [#allocation7], %s4260_s25, %s4260_s25, %s4261_s26  }
 0x869   :  { %4254 = dma.done.wait [#allocation7], 1024  }
 0x86a   :  { %4255 = vsyncadd [#allocation7], 4294966272 }
 0x86b   :  { %3339 = vsyncpa [#allocation6], 1 }
 0x86c   :  { %3340 = vsyncpa [#allocation9], 1 }
 0x86d   :  { %3341 = vsyncpa [#allocation7], 1 }

</bundles_post_ra>
